<compile_context>
chip_gen: v6e
topology: v6e:2x2x1
jax: 0.10.0
libtpu: 0.0.40
codegen_flags: <defaults>
</compile_context>

<pallas_src>
import functools

import jax
import jax.numpy as jnp
from jax.experimental import pallas as pl
from jax.experimental.pallas import tpu as pltpu

BN_EPS = 1e-5
LANE = 128              # channel padding granularity (lane width)
MAX_TILE_HW = 512       # spatial rows per matmul block; halve for v7x (64 MiB VMEM)
ACT_DTYPE = jnp.bfloat16   # inter-layer activation storage
W_DTYPE = jnp.bfloat16     # MXU operand dtype


# --------------------------- small helpers ----------------------------------

def _round_up(x, m):
    return ((x + m - 1) // m) * m


def _cpad(c):
    return _round_up(c, LANE)


def _pick_tile(total, max_tile=MAX_TILE_HW):
    """Largest tile (multiple of 16, or the full extent) that divides `total`."""
    if total <= max_tile:
        return total
    for t in (512, 256, 128, 64, 32, 16):
        if t <= max_tile and total % t == 0:
            return t
    return total


# --------------------------- Pallas kernels ---------------------------------

def _conv1x1_kernel(x_ref, w_ref, scale_ref, bias_ref, o_ref, *, act):
    """y = act((x @ w) * scale + bias) on one (1, tile, Cin) block."""
    x = x_ref[0]                                              # (T, Cin) bf16
    y = jnp.dot(x, w_ref[...], preferred_element_type=jnp.float32)
    y = y * scale_ref[...] + bias_ref[...]                    # f32 epilogue
    if act == "silu":
        y = y * jax.nn.sigmoid(y)
    o_ref[...] = y[None].astype(o_ref.dtype)


def _proj_kernel(x_ref, s_ref, w_ref, scale_ref, bias_ref, *rest, has_skip):
    """Projection 1x1 conv with fused SE channel scale and (optional) residual."""
    if has_skip:
        skip_ref, o_ref = rest
    else:
        (o_ref,) = rest
    se = s_ref[0]                                             # (1, Cexp) f32
    x = x_ref[0].astype(jnp.float32) * se                     # fused SE gate
    y = jnp.dot(x.astype(W_DTYPE), w_ref[...],
                preferred_element_type=jnp.float32)
    y = y * scale_ref[...] + bias_ref[...]
    if has_skip:
        y = y + skip_ref[0].astype(jnp.float32)               # fused residual
    o_ref[...] = y[None].astype(o_ref.dtype)


def _dw3x3_kernel(x_ref, w_ref, scale_ref, bias_ref, y_ref, pool_ref, xpad_ref,
                  *, stride):
    """Depthwise 3x3 + folded BN + SiLU for one batch element.

    Stride-2 outputs are produced directly (strided reads from the padded
    VMEM scratch); the SE global-average pool of the result is co-computed.
    Only the 1-pixel halo border of the scratch is zeroed (the interior is
    fully overwritten each step), avoiding a full-scratch clear pass.
    """
    _, h, w, c = x_ref.shape
    _, ho, wo, _ = y_ref.shape

    # Zero just the halo border, then write the interior.
    xpad_ref[0:1, :, :] = jnp.zeros((1, w + 2, c), jnp.float32)
    xpad_ref[h + 1:h + 2, :, :] = jnp.zeros((1, w + 2, c), jnp.float32)
    xpad_ref[:, 0:1, :] = jnp.zeros((h + 2, 1, c), jnp.float32)
    xpad_ref[:, w + 1:w + 2, :] = jnp.zeros((h + 2, 1, c), jnp.float32)
    xpad_ref[1:h + 1, 1:w + 1, :] = x_ref[0].astype(jnp.float32)

    taps = w_ref[...].astype(jnp.float32)                     # (9, C)
    acc = jnp.zeros((ho, wo, c), jnp.float32)
    for ky in range(3):
        for kx in range(3):
            if stride == 1:
                win = xpad_ref[ky:ky + ho, kx:kx + wo, :]
            else:
                win = xpad_ref[pl.ds(ky, ho, stride), pl.ds(kx, wo, stride), :]
            k = ky * 3 + kx
            acc = acc + win * taps[k:k + 1, :].reshape(1, 1, c)

    y = acc * scale_ref[...].reshape(1, 1, c) + bias_ref[...].reshape(1, 1, c)
    y = y * jax.nn.sigmoid(y)                                 # SiLU
    y_ref[...] = y[None].astype(y_ref.dtype)

    pooled = jnp.sum(y, axis=0, keepdims=True)                # (1, wo, c)
    pooled = jnp.sum(pooled, axis=1, keepdims=True)           # (1, 1, c)
    pool_ref[...] = pooled * (1.0 / float(ho * wo))


def _stem_kernel(x_ref, w_ref, scale_ref, bias_ref, o_ref, xpad_ref):
    """Dense 3x3, stride 2, padding 1 stem conv + folded BN (Identity act)."""
    _, h, w, cin = x_ref.shape
    _, ho, wo, cout = o_ref.shape

    xpad_ref[...] = jnp.zeros_like(xpad_ref)     # cin is tiny (3); full clear is cheap
    xpad_ref[1:h + 1, 1:w + 1, :] = x_ref[0].astype(jnp.float32)

    taps = w_ref[...].astype(jnp.float32)                     # (9, Cin, Cout)
    acc = jnp.zeros((ho, wo, cout), jnp.float32)
    for ky in range(3):
        for kx in range(3):
            win = xpad_ref[pl.ds(ky, ho, 2), pl.ds(kx, wo, 2), :]   # (ho, wo, cin)
            k = ky * 3 + kx
            for ci in range(cin):
                tap = taps[k:k + 1, ci:ci + 1, :].reshape(1, 1, cout)
                acc = acc + win[:, :, ci:ci + 1] * tap
    y = acc * scale_ref[...].reshape(1, 1, cout) + bias_ref[...].reshape(1, 1, cout)
    # Stem ConvBNSiLU uses the default activation = Identity (no SiLU).
    o_ref[...] = y[None].astype(o_ref.dtype)


def _se_fc_kernel(p_ref, w1_ref, b1_ref, w2_ref, b2_ref, s_ref):
    """SE gate from the pooled features: sigmoid(silu(p@w1+b1)@w2+b2)."""
    p = p_ref[...].astype(W_DTYPE)                            # (N, Cexp)
    h = jnp.dot(p, w1_ref[...], preferred_element_type=jnp.float32) + b1_ref[...]
    h = h * jax.nn.sigmoid(h)                                 # SiLU
    s = jnp.dot(h.astype(W_DTYPE), w2_ref[...],
                preferred_element_type=jnp.float32) + b2_ref[...]
    s_ref[...] = jax.nn.sigmoid(s)


def _head_pool_fc_kernel(x_ref, wh_ref, sc_ref, bi_ref, wf_ref, bf_ref, o_ref):
    """Fused head: 1x1 conv + BN + SiLU -> global average pool -> Linear."""
    x = x_ref[0]                                              # (HW, Cin) bf16
    h = jnp.dot(x, wh_ref[...], preferred_element_type=jnp.float32)
    h = h * sc_ref[...] + bi_ref[...]
    h = h * jax.nn.sigmoid(h)                                 # SiLU
    pooled = jnp.mean(h, axis=0, keepdims=True)               # (1, Chead) f32
    logits = jnp.dot(pooled.astype(W_DTYPE), wf_ref[...],
                     preferred_element_type=jnp.float32) + bf_ref[...]
    o_ref[...] = logits                                       # (1, Ncls)


# --------------------------- wrappers (pallas_call) --------------------------

def conv1x1_bn_act(x, w, scale, bias, act="none"):
    """x: (N, HW, Cin) -> (N, HW, Cout), tiled over (batch, spatial)."""
    n, hw, cin = x.shape
    cout = w.shape[1]
    tile = _pick_tile(hw)
    return pl.pallas_call(
        functools.partial(_conv1x1_kernel, act=act),
        grid=(n, hw // tile),
        in_specs=[
            pl.BlockSpec((1, tile, cin), lambda b, i: (b, i, 0)),
            pl.BlockSpec((cin, cout), lambda b, i: (0, 0)),
            pl.BlockSpec((1, cout), lambda b, i: (0, 0)),
            pl.BlockSpec((1, cout), lambda b, i: (0, 0)),
        ],
        out_specs=pl.BlockSpec((1, tile, cout), lambda b, i: (b, i, 0)),
        out_shape=jax.ShapeDtypeStruct((n, hw, cout), ACT_DTYPE),
        compiler_params=pltpu.CompilerParams(
            dimension_semantics=("parallel", "parallel")),
    )(x, w, scale, bias)


def proj_se_residual(x, se_gate_v, w, scale, bias, skip):
    """Projection 1x1 conv with fused SE scale and optional residual add."""
    n, hw, cexp = x.shape
    cout = w.shape[1]
    tile = _pick_tile(hw)
    has_skip = skip is not None
    in_specs = [
        pl.BlockSpec((1, tile, cexp), lambda b, i: (b, i, 0)),
        pl.BlockSpec((1, 1, cexp), lambda b, i: (b, 0, 0)),
        pl.BlockSpec((cexp, cout), lambda b, i: (0, 0)),
        pl.BlockSpec((1, cout), lambda b, i: (0, 0)),
        pl.BlockSpec((1, cout), lambda b, i: (0, 0)),
    ]
    args = [x, se_gate_v.reshape(n, 1, cexp), w, scale, bias]
    if has_skip:
        in_specs.append(pl.BlockSpec((1, tile, cout), lambda b, i: (b, i, 0)))
        args.append(skip)
    return pl.pallas_call(
        functools.partial(_proj_kernel, has_skip=has_skip),
        grid=(n, hw // tile),
        in_specs=in_specs,
        out_specs=pl.BlockSpec((1, tile, cout), lambda b, i: (b, i, 0)),
        out_shape=jax.ShapeDtypeStruct((n, hw, cout), ACT_DTYPE),
        compiler_params=pltpu.CompilerParams(
            dimension_semantics=("parallel", "parallel")),
    )(*args)


def dwconv3x3_bn_silu(x, w9, scale, bias, stride):
    """x: (N, H, W, C) -> (y: (N, Ho, Wo, C), SE pooled means: (N, C))."""
    n, h, w, c = x.shape
    ho = (h - 1) // stride + 1
    wo = (w - 1) // stride + 1
    y, pooled = pl.pallas_call(
        functools.partial(_dw3x3_kernel, stride=stride),
        grid=(n,),
        in_specs=[
            pl.BlockSpec((1, h, w, c), lambda b: (b, 0, 0, 0)),
            pl.BlockSpec((9, c), lambda b: (0, 0)),
            pl.BlockSpec((1, c), lambda b: (0, 0)),
            pl.BlockSpec((1, c), lambda b: (0, 0)),
        ],
        out_specs=[
            pl.BlockSpec((1, ho, wo, c), lambda b: (b, 0, 0, 0)),
            pl.BlockSpec((1, 1, c), lambda b: (b, 0, 0)),
        ],
        out_shape=(
            jax.ShapeDtypeStruct((n, ho, wo, c), ACT_DTYPE),
            jax.ShapeDtypeStruct((n, 1, c), jnp.float32),
        ),
        scratch_shapes=[pltpu.VMEM((h + 2, w + 2, c), jnp.float32)],
        compiler_params=pltpu.CompilerParams(dimension_semantics=("parallel",)),
    )(x, w9, scale, bias)
    return y, pooled.reshape(n, c)


def stem_conv(x, w, scale, bias):
    n, h, wd, cin = x.shape
    cout = w.shape[-1]
    ho = (h - 1) // 2 + 1
    wo = (wd - 1) // 2 + 1
    return pl.pallas_call(
        _stem_kernel,
        grid=(n,),
        in_specs=[
            pl.BlockSpec((1, h, wd, cin), lambda b: (b, 0, 0, 0)),
            pl.BlockSpec((9, cin, cout), lambda b: (0, 0, 0)),
            pl.BlockSpec((1, cout), lambda b: (0, 0)),
            pl.BlockSpec((1, cout), lambda b: (0, 0)),
        ],
        out_specs=pl.BlockSpec((1, ho, wo, cout), lambda b: (b, 0, 0, 0)),
        out_shape=jax.ShapeDtypeStruct((n, ho, wo, cout), ACT_DTYPE),
        scratch_shapes=[pltpu.VMEM((h + 2, wd + 2, cin), jnp.float32)],
        compiler_params=pltpu.CompilerParams(dimension_semantics=("parallel",)),
    )(x, w, scale, bias)


def se_gate(pooled, w1, b1, w2, b2):
    n, c = pooled.shape
    return pl.pallas_call(
        _se_fc_kernel,
        out_shape=jax.ShapeDtypeStruct((n, c), jnp.float32),
    )(pooled, w1, b1, w2, b2)


def head_pool_fc(x, w_head, scale, bias, w_fc, b_fc):
    """Fused: 1x1 head conv + BN + SiLU + global avg pool + final Linear."""
    n, hw, cin = x.shape
    chead = w_head.shape[1]
    nclsp = w_fc.shape[1]
    return pl.pallas_call(
        _head_pool_fc_kernel,
        grid=(n,),
        in_specs=[
            pl.BlockSpec((1, hw, cin), lambda b: (b, 0, 0)),
            pl.BlockSpec((cin, chead), lambda b: (0, 0)),
            pl.BlockSpec((1, chead), lambda b: (0, 0)),
            pl.BlockSpec((1, chead), lambda b: (0, 0)),
            pl.BlockSpec((chead, nclsp), lambda b: (0, 0)),
            pl.BlockSpec((1, nclsp), lambda b: (0, 0)),
        ],
        out_specs=pl.BlockSpec((1, nclsp), lambda b: (b, 0)),
        out_shape=jax.ShapeDtypeStruct((n, nclsp), jnp.float32),
        compiler_params=pltpu.CompilerParams(dimension_semantics=("parallel",)),
    )(x, w_head, scale, bias, w_fc, b_fc)


# --------------------------- network composition -----------------------------

def mbconv(x, p):
    n, h, w, cin = x.shape
    stride = p["stride"]
    cexp = p["expand_w"].shape[1]
    cout = p["proj_w"].shape[1]

    # expand 1x1 + BN + SiLU
    y = conv1x1_bn_act(x.reshape(n, h * w, cin),
                       p["expand_w"], p["expand_scale"], p["expand_bias"],
                       act="silu")
    # depthwise 3x3 + BN + SiLU (direct stride-s) + SE pooled means
    y, pooled = dwconv3x3_bn_silu(y.reshape(n, h, w, cexp),
                                  p["dw_w"], p["dw_scale"], p["dw_bias"], stride)
    ho, wo = y.shape[1], y.shape[2]
    # SE gate (tiny FCs on pooled features)
    gate = se_gate(pooled, p["se_w1"], p["se_b1"], p["se_w2"], p["se_b2"])
    # projection 1x1 + BN with fused SE scale (+ fused residual when shapes match)
    skip = x.reshape(n, h * w, cin) if p["in_c"] == p["out_c"] else None
    out = proj_se_residual(y.reshape(n, ho * wo, cexp), gate,
                           p["proj_w"], p["proj_scale"], p["proj_bias"], skip)
    return out.reshape(n, ho, wo, cout)


def efficientnet_b0(x_nchw, params):
    x = jnp.transpose(x_nchw, (0, 2, 3, 1)).astype(ACT_DTYPE)   # NCHW -> NHWC
    x = stem_conv(x, params["stem"]["w"], params["stem"]["scale"],
                  params["stem"]["bias"])
    for stage in params["stages"]:
        for blk in stage:
            x = mbconv(x, blk)
    n, h, w, c = x.shape
    logits = head_pool_fc(x.reshape(n, h * w, c),
                          params["head"]["w"], params["head"]["scale"],
                          params["head"]["bias"],
                          params["fc"]["w"], params["fc"]["b"])
    return logits[:, :params["n_classes"]]


# --------------------------- parameter construction --------------------------

def _bn_fold(c, c_pad):
    gamma = jnp.ones((c,), jnp.float32)
    beta = jnp.zeros((c,), jnp.float32)
    mean = jnp.zeros((c,), jnp.float32)
    var = jnp.ones((c,), jnp.float32)
    scale = gamma / jnp.sqrt(var + BN_EPS)
    bias = beta - mean * scale
    scale = jnp.pad(scale, (0, c_pad - c)).reshape(1, c_pad)
    bias = jnp.pad(bias, (0, c_pad - c)).reshape(1, c_pad)
    return scale, bias


def _padded(a, shape, dtype):
    pads = [(0, t - s) for s, t in zip(a.shape, shape)]
    return jnp.pad(a, pads).astype(dtype)


def init_params(key, in_channels, n_classes):
    CFG = [1, 2, 2, 3, 3, 4, 1]
    stage_cfg = [
        # (num_layers, in_c, out_c, channels_factor, downsample)
        (CFG[0], 32, 16, 1, False),
        (CFG[1], 16, 24, 6, True),
        (CFG[2], 24, 40, 6, True),
        (CFG[3], 40, 80, 6, True),
        (CFG[4], 80, 112, 6, False),
        (CFG[5], 112, 192, 6, True),
        (CFG[6], 192, 320, 6, False),
    ]
    counter = [0]

    def nxt():
        counter[0] += 1
        return jax.random.fold_in(key, counter[0])

    def w(shape, std=0.05):
        return jax.random.normal(nxt(), shape, jnp.float32) * std

    params = {"n_classes": n_classes}

    c0, c0p = 32, _cpad(32)
    s, b = _bn_fold(c0, c0p)
    params["stem"] = {
        "w": _padded(w((3, 3, in_channels, c0)).reshape(9, in_channels, c0),
                     (9, in_channels, c0p), W_DTYPE),
        "scale": s, "bias": b,
    }

    stages = []
    for (nl, in_c, out_c, factor, down) in stage_cfg:
        blocks = []
        for i in range(nl):
            ci = in_c if i == 0 else out_c
            stride = 2 if (down and i == 0) else 1
            tmp = ci * factor
            red = tmp // 4
            cip, tmpp = _cpad(ci), _cpad(tmp)
            redp, outp = _cpad(red), _cpad(out_c)
            es, eb = _bn_fold(tmp, tmpp)
            ds, db = _bn_fold(tmp, tmpp)
            ps, pb = _bn_fold(out_c, outp)
            blocks.append({
                "in_c": ci, "out_c": out_c, "stride": stride,
                "expand_w": _padded(w((ci, tmp)), (cip, tmpp), W_DTYPE),
                "expand_scale": es, "expand_bias": eb,
                "dw_w": _padded(w((3, 3, tmp)).reshape(9, tmp), (9, tmpp),
                                jnp.float32),
                "dw_scale": ds, "dw_bias": db,
                "se_w1": _padded(w((tmp, red)), (tmpp, redp), W_DTYPE),
                "se_b1": _padded(w((red,)).reshape(1, red), (1, redp), jnp.float32),
                "se_w2": _padded(w((red, tmp)), (redp, tmpp), W_DTYPE),
                "se_b2": _padded(w((tmp,)).reshape(1, tmp), (1, tmpp), jnp.float32),
                "proj_w": _padded(w((tmp, out_c)), (tmpp, outp), W_DTYPE),
                "proj_scale": ps, "proj_bias": pb,
            })
        stages.append(blocks)
    params["stages"] = stages

    c_head, c_headp = 1280, _cpad(1280)
    hs, hb = _bn_fold(c_head, c_headp)
    params["head"] = {
        "w": _padded(w((320, c_head)), (_cpad(320), c_headp), W_DTYPE),
        "scale": hs, "bias": hb,
    }
    nclsp = _cpad(n_classes)
    params["fc"] = {
        "w": _padded(w((c_head, n_classes)), (c_headp, nclsp), W_DTYPE),
        "b": _padded(w((n_classes,)).reshape(1, n_classes), (1, nclsp),
                     jnp.float32),
    }
    return params


# --------------------------------- main --------------------------------------

if __name__ == "__main__":
    key = jax.random.PRNGKey(0)
    k_in, k_par = jax.random.split(key)

    in_channels = 3
    n_classes = 10
    x = jax.random.normal(k_in, (2, in_channels, 16, 16), jnp.float32)  # NCHW

    params = init_params(k_par, in_channels, n_classes)
    logits = efficientnet_b0(x, params)
    logits = jax.block_until_ready(logits)

    assert logits.shape == (2, n_classes), logits.shape
    assert bool(jnp.all(jnp.isfinite(logits)))
    print("KERNEL_OK")
</pallas_src>

<mosaic_0001>
module attributes {stable_mosaic.version = 11 : i64} {
  func.func @_stem_kernel(%arg0: i32, %arg1: memref<1x16x16x3xbf16, #tpu.memory_space<vmem>>, %arg2: memref<9x3x128xbf16, #tpu.memory_space<vmem>>, %arg3: memref<1x128xf32, #tpu.memory_space<vmem>>, %arg4: memref<1x128xf32, #tpu.memory_space<vmem>>, %arg5: memref<1x8x8x128xbf16, #tpu.memory_space<vmem>>, %arg6: memref<18x18x3xf32, #tpu.memory_space<vmem>>) attributes {dimension_semantics = [#tpu.dimension_semantics<parallel>], iteration_bounds = array<i64: 2>, scalar_prefetch = 0 : i64, scratch_operands = 1 : i64, tpu.core_type = #tpu.core_type<tc>, window_params = [{transform_indices = @transform_0, window_bounds = array<i64: 1, 16, 16, 3>}, {pipeline_mode = #tpu.pipeline_mode<synchronous>, transform_indices = @transform_1, window_bounds = array<i64: 9, 3, 128>}, {pipeline_mode = #tpu.pipeline_mode<synchronous>, transform_indices = @transform_2, window_bounds = array<i64: 1, 128>}, {pipeline_mode = #tpu.pipeline_mode<synchronous>, transform_indices = @transform_3, window_bounds = array<i64: 1, 128>}, {transform_indices = @transform_4, window_bounds = array<i64: 1, 8, 8, 128>}]} {
    %cst = arith.constant 0.000000e+00 : f32
    %0 = vector.broadcast %cst : f32 to vector<18x18x3xf32>
    %c0 = arith.constant 0 : index
    %c0_0 = arith.constant 0 : index
    %c0_1 = arith.constant 0 : index
    %1 = vector.load %arg6[%c0, %c0_0, %c0_1] : memref<18x18x3xf32, #tpu.memory_space<vmem>>, vector<18x18x3xf32>
    tpu.vector_store %arg6[%c0, %c0_0, %c0_1], %0 {strides = array<i32>} : memref<18x18x3xf32, #tpu.memory_space<vmem>>, vector<18x18x3xf32>,
    %c0_2 = arith.constant 0 : index
    %c0_3 = arith.constant 0 : index
    %c0_4 = arith.constant 0 : index
    %c0_5 = arith.constant 0 : index
    %2 = vector.load %arg1[%c0_2, %c0_3, %c0_4, %c0_5] : memref<1x16x16x3xbf16, #tpu.memory_space<vmem>>, vector<1x16x16x3xbf16>
    %3 = vector.shape_cast %2 : vector<1x16x16x3xbf16> to vector<16x16x3xbf16>
    %4 = arith.extf %3 : vector<16x16x3xbf16> to vector<16x16x3xf32>
    %c1 = arith.constant 1 : index
    %c1_6 = arith.constant 1 : index
    %c0_7 = arith.constant 0 : index
    %5 = vector.load %arg6[%c1, %c1_6, %c0_7] : memref<18x18x3xf32, #tpu.memory_space<vmem>>, vector<16x16x3xf32>
    tpu.vector_store %arg6[%c1, %c1_6, %c0_7], %4 {strides = array<i32>} : memref<18x18x3xf32, #tpu.memory_space<vmem>>, vector<16x16x3xf32>,
    %c0_8 = arith.constant 0 : index
    %c0_9 = arith.constant 0 : index
    %c0_10 = arith.constant 0 : index
    %6 = vector.load %arg2[%c0_8, %c0_9, %c0_10] : memref<9x3x128xbf16, #tpu.memory_space<vmem>>, vector<9x3x128xbf16>
    %7 = arith.extf %6 : vector<9x3x128xbf16> to vector<9x3x128xf32>
    %cst_11 = arith.constant 0.000000e+00 : f32
    %8 = vector.broadcast %cst_11 : f32 to vector<8x8x128xf32>
    %c0_12 = arith.constant 0 : index
    %c0_13 = arith.constant 0 : index
    %c0_14 = arith.constant 0 : index
    %9 = tpu.strided_load %arg6[%c0_12, %c0_13, %c0_14] {strides = array<i32: 2, 2, 1>} : memref<18x18x3xf32, #tpu.memory_space<vmem>>, vector<8x8x3xf32>
    %10 = vector.extract_strided_slice %7 {offsets = [0, 0, 0], sizes = [1, 1, 128], strides = [1, 1, 1]} : vector<9x3x128xf32> to vector<1x1x128xf32>
    %11 = vector.extract_strided_slice %9 {offsets = [0, 0, 0], sizes = [8, 8, 1], strides = [1, 1, 1]} : vector<8x8x3xf32> to vector<8x8x1xf32>
    %12 = vector.broadcast %11 : vector<8x8x1xf32> to vector<8x8x128xf32>
    %13 = vector.broadcast %10 : vector<1x1x128xf32> to vector<8x8x128xf32>
    %14 = arith.mulf %12, %13 : vector<8x8x128xf32>
    %15 = arith.addf %8, %14 : vector<8x8x128xf32>
    %16 = vector.extract_strided_slice %7 {offsets = [0, 1, 0], sizes = [1, 1, 128], strides = [1, 1, 1]} : vector<9x3x128xf32> to vector<1x1x128xf32>
    %17 = vector.extract_strided_slice %9 {offsets = [0, 0, 1], sizes = [8, 8, 1], strides = [1, 1, 1]} : vector<8x8x3xf32> to vector<8x8x1xf32>
    %18 = vector.broadcast %17 : vector<8x8x1xf32> to vector<8x8x128xf32>
    %19 = vector.broadcast %16 : vector<1x1x128xf32> to vector<8x8x128xf32>
    %20 = arith.mulf %18, %19 : vector<8x8x128xf32>
    %21 = arith.addf %15, %20 : vector<8x8x128xf32>
    %22 = vector.extract_strided_slice %7 {offsets = [0, 2, 0], sizes = [1, 1, 128], strides = [1, 1, 1]} : vector<9x3x128xf32> to vector<1x1x128xf32>
    %23 = vector.extract_strided_slice %9 {offsets = [0, 0, 2], sizes = [8, 8, 1], strides = [1, 1, 1]} : vector<8x8x3xf32> to vector<8x8x1xf32>
    %24 = vector.broadcast %23 : vector<8x8x1xf32> to vector<8x8x128xf32>
    %25 = vector.broadcast %22 : vector<1x1x128xf32> to vector<8x8x128xf32>
    %26 = arith.mulf %24, %25 : vector<8x8x128xf32>
    %27 = arith.addf %21, %26 : vector<8x8x128xf32>
    %c0_15 = arith.constant 0 : index
    %c1_16 = arith.constant 1 : index
    %c0_17 = arith.constant 0 : index
    %28 = tpu.strided_load %arg6[%c0_15, %c1_16, %c0_17] {strides = array<i32: 2, 2, 1>} : memref<18x18x3xf32, #tpu.memory_space<vmem>>, vector<8x8x3xf32>
    %29 = vector.extract_strided_slice %7 {offsets = [1, 0, 0], sizes = [1, 1, 128], strides = [1, 1, 1]} : vector<9x3x128xf32> to vector<1x1x128xf32>
    %30 = vector.extract_strided_slice %28 {offsets = [0, 0, 0], sizes = [8, 8, 1], strides = [1, 1, 1]} : vector<8x8x3xf32> to vector<8x8x1xf32>
    %31 = vector.broadcast %30 : vector<8x8x1xf32> to vector<8x8x128xf32>
    %32 = vector.broadcast %29 : vector<1x1x128xf32> to vector<8x8x128xf32>
    %33 = arith.mulf %31, %32 : vector<8x8x128xf32>
    %34 = arith.addf %27, %33 : vector<8x8x128xf32>
    %35 = vector.extract_strided_slice %7 {offsets = [1, 1, 0], sizes = [1, 1, 128], strides = [1, 1, 1]} : vector<9x3x128xf32> to vector<1x1x128xf32>
    %36 = vector.extract_strided_slice %28 {offsets = [0, 0, 1], sizes = [8, 8, 1], strides = [1, 1, 1]} : vector<8x8x3xf32> to vector<8x8x1xf32>
    %37 = vector.broadcast %36 : vector<8x8x1xf32> to vector<8x8x128xf32>
    %38 = vector.broadcast %35 : vector<1x1x128xf32> to vector<8x8x128xf32>
    %39 = arith.mulf %37, %38 : vector<8x8x128xf32>
    %40 = arith.addf %34, %39 : vector<8x8x128xf32>
    %41 = vector.extract_strided_slice %7 {offsets = [1, 2, 0], sizes = [1, 1, 128], strides = [1, 1, 1]} : vector<9x3x128xf32> to vector<1x1x128xf32>
    %42 = vector.extract_strided_slice %28 {offsets = [0, 0, 2], sizes = [8, 8, 1], strides = [1, 1, 1]} : vector<8x8x3xf32> to vector<8x8x1xf32>
    %43 = vector.broadcast %42 : vector<8x8x1xf32> to vector<8x8x128xf32>
    %44 = vector.broadcast %41 : vector<1x1x128xf32> to vector<8x8x128xf32>
    %45 = arith.mulf %43, %44 : vector<8x8x128xf32>
    %46 = arith.addf %40, %45 : vector<8x8x128xf32>
    %c0_18 = arith.constant 0 : index
    %c2 = arith.constant 2 : index
    %c0_19 = arith.constant 0 : index
    %47 = tpu.strided_load %arg6[%c0_18, %c2, %c0_19] {strides = array<i32: 2, 2, 1>} : memref<18x18x3xf32, #tpu.memory_space<vmem>>, vector<8x8x3xf32>
    %48 = vector.extract_strided_slice %7 {offsets = [2, 0, 0], sizes = [1, 1, 128], strides = [1, 1, 1]} : vector<9x3x128xf32> to vector<1x1x128xf32>
    %49 = vector.extract_strided_slice %47 {offsets = [0, 0, 0], sizes = [8, 8, 1], strides = [1, 1, 1]} : vector<8x8x3xf32> to vector<8x8x1xf32>
    %50 = vector.broadcast %49 : vector<8x8x1xf32> to vector<8x8x128xf32>
    %51 = vector.broadcast %48 : vector<1x1x128xf32> to vector<8x8x128xf32>
    %52 = arith.mulf %50, %51 : vector<8x8x128xf32>
    %53 = arith.addf %46, %52 : vector<8x8x128xf32>
    %54 = vector.extract_strided_slice %7 {offsets = [2, 1, 0], sizes = [1, 1, 128], strides = [1, 1, 1]} : vector<9x3x128xf32> to vector<1x1x128xf32>
    %55 = vector.extract_strided_slice %47 {offsets = [0, 0, 1], sizes = [8, 8, 1], strides = [1, 1, 1]} : vector<8x8x3xf32> to vector<8x8x1xf32>
    %56 = vector.broadcast %55 : vector<8x8x1xf32> to vector<8x8x128xf32>
    %57 = vector.broadcast %54 : vector<1x1x128xf32> to vector<8x8x128xf32>
    %58 = arith.mulf %56, %57 : vector<8x8x128xf32>
    %59 = arith.addf %53, %58 : vector<8x8x128xf32>
    %60 = vector.extract_strided_slice %7 {offsets = [2, 2, 0], sizes = [1, 1, 128], strides = [1, 1, 1]} : vector<9x3x128xf32> to vector<1x1x128xf32>
    %61 = vector.extract_strided_slice %47 {offsets = [0, 0, 2], sizes = [8, 8, 1], strides = [1, 1, 1]} : vector<8x8x3xf32> to vector<8x8x1xf32>
    %62 = vector.broadcast %61 : vector<8x8x1xf32> to vector<8x8x128xf32>
    %63 = vector.broadcast %60 : vector<1x1x128xf32> to vector<8x8x128xf32>
    %64 = arith.mulf %62, %63 : vector<8x8x128xf32>
    %65 = arith.addf %59, %64 : vector<8x8x128xf32>
    %c1_20 = arith.constant 1 : index
    %c0_21 = arith.constant 0 : index
    %c0_22 = arith.constant 0 : index
    %66 = tpu.strided_load %arg6[%c1_20, %c0_21, %c0_22] {strides = array<i32: 2, 2, 1>} : memref<18x18x3xf32, #tpu.memory_space<vmem>>, vector<8x8x3xf32>
    %67 = vector.extract_strided_slice %7 {offsets = [3, 0, 0], sizes = [1, 1, 128], strides = [1, 1, 1]} : vector<9x3x128xf32> to vector<1x1x128xf32>
    %68 = vector.extract_strided_slice %66 {offsets = [0, 0, 0], sizes = [8, 8, 1], strides = [1, 1, 1]} : vector<8x8x3xf32> to vector<8x8x1xf32>
    %69 = vector.broadcast %68 : vector<8x8x1xf32> to vector<8x8x128xf32>
    %70 = vector.broadcast %67 : vector<1x1x128xf32> to vector<8x8x128xf32>
    %71 = arith.mulf %69, %70 : vector<8x8x128xf32>
    %72 = arith.addf %65, %71 : vector<8x8x128xf32>
    %73 = vector.extract_strided_slice %7 {offsets = [3, 1, 0], sizes = [1, 1, 128], strides = [1, 1, 1]} : vector<9x3x128xf32> to vector<1x1x128xf32>
    %74 = vector.extract_strided_slice %66 {offsets = [0, 0, 1], sizes = [8, 8, 1], strides = [1, 1, 1]} : vector<8x8x3xf32> to vector<8x8x1xf32>
    %75 = vector.broadcast %74 : vector<8x8x1xf32> to vector<8x8x128xf32>
    %76 = vector.broadcast %73 : vector<1x1x128xf32> to vector<8x8x128xf32>
    %77 = arith.mulf %75, %76 : vector<8x8x128xf32>
    %78 = arith.addf %72, %77 : vector<8x8x128xf32>
    %79 = vector.extract_strided_slice %7 {offsets = [3, 2, 0], sizes = [1, 1, 128], strides = [1, 1, 1]} : vector<9x3x128xf32> to vector<1x1x128xf32>
    %80 = vector.extract_strided_slice %66 {offsets = [0, 0, 2], sizes = [8, 8, 1], strides = [1, 1, 1]} : vector<8x8x3xf32> to vector<8x8x1xf32>
    %81 = vector.broadcast %80 : vector<8x8x1xf32> to vector<8x8x128xf32>
    %82 = vector.broadcast %79 : vector<1x1x128xf32> to vector<8x8x128xf32>
    %83 = arith.mulf %81, %82 : vector<8x8x128xf32>
    %84 = arith.addf %78, %83 : vector<8x8x128xf32>
    %c1_23 = arith.constant 1 : index
    %c1_24 = arith.constant 1 : index
    %c0_25 = arith.constant 0 : index
    %85 = tpu.strided_load %arg6[%c1_23, %c1_24, %c0_25] {strides = array<i32: 2, 2, 1>} : memref<18x18x3xf32, #tpu.memory_space<vmem>>, vector<8x8x3xf32>
    %86 = vector.extract_strided_slice %7 {offsets = [4, 0, 0], sizes = [1, 1, 128], strides = [1, 1, 1]} : vector<9x3x128xf32> to vector<1x1x128xf32>
    %87 = vector.extract_strided_slice %85 {offsets = [0, 0, 0], sizes = [8, 8, 1], strides = [1, 1, 1]} : vector<8x8x3xf32> to vector<8x8x1xf32>
    %88 = vector.broadcast %87 : vector<8x8x1xf32> to vector<8x8x128xf32>
    %89 = vector.broadcast %86 : vector<1x1x128xf32> to vector<8x8x128xf32>
    %90 = arith.mulf %88, %89 : vector<8x8x128xf32>
    %91 = arith.addf %84, %90 : vector<8x8x128xf32>
    %92 = vector.extract_strided_slice %7 {offsets = [4, 1, 0], sizes = [1, 1, 128], strides = [1, 1, 1]} : vector<9x3x128xf32> to vector<1x1x128xf32>
    %93 = vector.extract_strided_slice %85 {offsets = [0, 0, 1], sizes = [8, 8, 1], strides = [1, 1, 1]} : vector<8x8x3xf32> to vector<8x8x1xf32>
    %94 = vector.broadcast %93 : vector<8x8x1xf32> to vector<8x8x128xf32>
    %95 = vector.broadcast %92 : vector<1x1x128xf32> to vector<8x8x128xf32>
    %96 = arith.mulf %94, %95 : vector<8x8x128xf32>
    %97 = arith.addf %91, %96 : vector<8x8x128xf32>
    %98 = vector.extract_strided_slice %7 {offsets = [4, 2, 0], sizes = [1, 1, 128], strides = [1, 1, 1]} : vector<9x3x128xf32> to vector<1x1x128xf32>
    %99 = vector.extract_strided_slice %85 {offsets = [0, 0, 2], sizes = [8, 8, 1], strides = [1, 1, 1]} : vector<8x8x3xf32> to vector<8x8x1xf32>
    %100 = vector.broadcast %99 : vector<8x8x1xf32> to vector<8x8x128xf32>
    %101 = vector.broadcast %98 : vector<1x1x128xf32> to vector<8x8x128xf32>
    %102 = arith.mulf %100, %101 : vector<8x8x128xf32>
    %103 = arith.addf %97, %102 : vector<8x8x128xf32>
    %c1_26 = arith.constant 1 : index
    %c2_27 = arith.constant 2 : index
    %c0_28 = arith.constant 0 : index
    %104 = tpu.strided_load %arg6[%c1_26, %c2_27, %c0_28] {strides = array<i32: 2, 2, 1>} : memref<18x18x3xf32, #tpu.memory_space<vmem>>, vector<8x8x3xf32>
    %105 = vector.extract_strided_slice %7 {offsets = [5, 0, 0], sizes = [1, 1, 128], strides = [1, 1, 1]} : vector<9x3x128xf32> to vector<1x1x128xf32>
    %106 = vector.extract_strided_slice %104 {offsets = [0, 0, 0], sizes = [8, 8, 1], strides = [1, 1, 1]} : vector<8x8x3xf32> to vector<8x8x1xf32>
    %107 = vector.broadcast %106 : vector<8x8x1xf32> to vector<8x8x128xf32>
    %108 = vector.broadcast %105 : vector<1x1x128xf32> to vector<8x8x128xf32>
    %109 = arith.mulf %107, %108 : vector<8x8x128xf32>
    %110 = arith.addf %103, %109 : vector<8x8x128xf32>
    %111 = vector.extract_strided_slice %7 {offsets = [5, 1, 0], sizes = [1, 1, 128], strides = [1, 1, 1]} : vector<9x3x128xf32> to vector<1x1x128xf32>
    %112 = vector.extract_strided_slice %104 {offsets = [0, 0, 1], sizes = [8, 8, 1], strides = [1, 1, 1]} : vector<8x8x3xf32> to vector<8x8x1xf32>
    %113 = vector.broadcast %112 : vector<8x8x1xf32> to vector<8x8x128xf32>
    %114 = vector.broadcast %111 : vector<1x1x128xf32> to vector<8x8x128xf32>
    %115 = arith.mulf %113, %114 : vector<8x8x128xf32>
    %116 = arith.addf %110, %115 : vector<8x8x128xf32>
    %117 = vector.extract_strided_slice %7 {offsets = [5, 2, 0], sizes = [1, 1, 128], strides = [1, 1, 1]} : vector<9x3x128xf32> to vector<1x1x128xf32>
    %118 = vector.extract_strided_slice %104 {offsets = [0, 0, 2], sizes = [8, 8, 1], strides = [1, 1, 1]} : vector<8x8x3xf32> to vector<8x8x1xf32>
    %119 = vector.broadcast %118 : vector<8x8x1xf32> to vector<8x8x128xf32>
    %120 = vector.broadcast %117 : vector<1x1x128xf32> to vector<8x8x128xf32>
    %121 = arith.mulf %119, %120 : vector<8x8x128xf32>
    %122 = arith.addf %116, %121 : vector<8x8x128xf32>
    %c2_29 = arith.constant 2 : index
    %c0_30 = arith.constant 0 : index
    %c0_31 = arith.constant 0 : index
    %123 = tpu.strided_load %arg6[%c2_29, %c0_30, %c0_31] {strides = array<i32: 2, 2, 1>} : memref<18x18x3xf32, #tpu.memory_space<vmem>>, vector<8x8x3xf32>
    %124 = vector.extract_strided_slice %7 {offsets = [6, 0, 0], sizes = [1, 1, 128], strides = [1, 1, 1]} : vector<9x3x128xf32> to vector<1x1x128xf32>
    %125 = vector.extract_strided_slice %123 {offsets = [0, 0, 0], sizes = [8, 8, 1], strides = [1, 1, 1]} : vector<8x8x3xf32> to vector<8x8x1xf32>
    %126 = vector.broadcast %125 : vector<8x8x1xf32> to vector<8x8x128xf32>
    %127 = vector.broadcast %124 : vector<1x1x128xf32> to vector<8x8x128xf32>
    %128 = arith.mulf %126, %127 : vector<8x8x128xf32>
    %129 = arith.addf %122, %128 : vector<8x8x128xf32>
    %130 = vector.extract_strided_slice %7 {offsets = [6, 1, 0], sizes = [1, 1, 128], strides = [1, 1, 1]} : vector<9x3x128xf32> to vector<1x1x128xf32>
    %131 = vector.extract_strided_slice %123 {offsets = [0, 0, 1], sizes = [8, 8, 1], strides = [1, 1, 1]} : vector<8x8x3xf32> to vector<8x8x1xf32>
    %132 = vector.broadcast %131 : vector<8x8x1xf32> to vector<8x8x128xf32>
    %133 = vector.broadcast %130 : vector<1x1x128xf32> to vector<8x8x128xf32>
    %134 = arith.mulf %132, %133 : vector<8x8x128xf32>
    %135 = arith.addf %129, %134 : vector<8x8x128xf32>
    %136 = vector.extract_strided_slice %7 {offsets = [6, 2, 0], sizes = [1, 1, 128], strides = [1, 1, 1]} : vector<9x3x128xf32> to vector<1x1x128xf32>
    %137 = vector.extract_strided_slice %123 {offsets = [0, 0, 2], sizes = [8, 8, 1], strides = [1, 1, 1]} : vector<8x8x3xf32> to vector<8x8x1xf32>
    %138 = vector.broadcast %137 : vector<8x8x1xf32> to vector<8x8x128xf32>
    %139 = vector.broadcast %136 : vector<1x1x128xf32> to vector<8x8x128xf32>
    %140 = arith.mulf %138, %139 : vector<8x8x128xf32>
    %141 = arith.addf %135, %140 : vector<8x8x128xf32>
    %c2_32 = arith.constant 2 : index
    %c1_33 = arith.constant 1 : index
    %c0_34 = arith.constant 0 : index
    %142 = tpu.strided_load %arg6[%c2_32, %c1_33, %c0_34] {strides = array<i32: 2, 2, 1>} : memref<18x18x3xf32, #tpu.memory_space<vmem>>, vector<8x8x3xf32>
    %143 = vector.extract_strided_slice %7 {offsets = [7, 0, 0], sizes = [1, 1, 128], strides = [1, 1, 1]} : vector<9x3x128xf32> to vector<1x1x128xf32>
    %144 = vector.extract_strided_slice %142 {offsets = [0, 0, 0], sizes = [8, 8, 1], strides = [1, 1, 1]} : vector<8x8x3xf32> to vector<8x8x1xf32>
    %145 = vector.broadcast %144 : vector<8x8x1xf32> to vector<8x8x128xf32>
    %146 = vector.broadcast %143 : vector<1x1x128xf32> to vector<8x8x128xf32>
    %147 = arith.mulf %145, %146 : vector<8x8x128xf32>
    %148 = arith.addf %141, %147 : vector<8x8x128xf32>
    %149 = vector.extract_strided_slice %7 {offsets = [7, 1, 0], sizes = [1, 1, 128], strides = [1, 1, 1]} : vector<9x3x128xf32> to vector<1x1x128xf32>
    %150 = vector.extract_strided_slice %142 {offsets = [0, 0, 1], sizes = [8, 8, 1], strides = [1, 1, 1]} : vector<8x8x3xf32> to vector<8x8x1xf32>
    %151 = vector.broadcast %150 : vector<8x8x1xf32> to vector<8x8x128xf32>
    %152 = vector.broadcast %149 : vector<1x1x128xf32> to vector<8x8x128xf32>
    %153 = arith.mulf %151, %152 : vector<8x8x128xf32>
    %154 = arith.addf %148, %153 : vector<8x8x128xf32>
    %155 = vector.extract_strided_slice %7 {offsets = [7, 2, 0], sizes = [1, 1, 128], strides = [1, 1, 1]} : vector<9x3x128xf32> to vector<1x1x128xf32>
    %156 = vector.extract_strided_slice %142 {offsets = [0, 0, 2], sizes = [8, 8, 1], strides = [1, 1, 1]} : vector<8x8x3xf32> to vector<8x8x1xf32>
    %157 = vector.broadcast %156 : vector<8x8x1xf32> to vector<8x8x128xf32>
    %158 = vector.broadcast %155 : vector<1x1x128xf32> to vector<8x8x128xf32>
    %159 = arith.mulf %157, %158 : vector<8x8x128xf32>
    %160 = arith.addf %154, %159 : vector<8x8x128xf32>
    %c2_35 = arith.constant 2 : index
    %c2_36 = arith.constant 2 : index
    %c0_37 = arith.constant 0 : index
    %161 = tpu.strided_load %arg6[%c2_35, %c2_36, %c0_37] {strides = array<i32: 2, 2, 1>} : memref<18x18x3xf32, #tpu.memory_space<vmem>>, vector<8x8x3xf32>
    %162 = vector.extract_strided_slice %7 {offsets = [8, 0, 0], sizes = [1, 1, 128], strides = [1, 1, 1]} : vector<9x3x128xf32> to vector<1x1x128xf32>
    %163 = vector.extract_strided_slice %161 {offsets = [0, 0, 0], sizes = [8, 8, 1], strides = [1, 1, 1]} : vector<8x8x3xf32> to vector<8x8x1xf32>
    %164 = vector.broadcast %163 : vector<8x8x1xf32> to vector<8x8x128xf32>
    %165 = vector.broadcast %162 : vector<1x1x128xf32> to vector<8x8x128xf32>
    %166 = arith.mulf %164, %165 : vector<8x8x128xf32>
    %167 = arith.addf %160, %166 : vector<8x8x128xf32>
    %168 = vector.extract_strided_slice %7 {offsets = [8, 1, 0], sizes = [1, 1, 128], strides = [1, 1, 1]} : vector<9x3x128xf32> to vector<1x1x128xf32>
    %169 = vector.extract_strided_slice %161 {offsets = [0, 0, 1], sizes = [8, 8, 1], strides = [1, 1, 1]} : vector<8x8x3xf32> to vector<8x8x1xf32>
    %170 = vector.broadcast %169 : vector<8x8x1xf32> to vector<8x8x128xf32>
    %171 = vector.broadcast %168 : vector<1x1x128xf32> to vector<8x8x128xf32>
    %172 = arith.mulf %170, %171 : vector<8x8x128xf32>
    %173 = arith.addf %167, %172 : vector<8x8x128xf32>
    %174 = vector.extract_strided_slice %7 {offsets = [8, 2, 0], sizes = [1, 1, 128], strides = [1, 1, 1]} : vector<9x3x128xf32> to vector<1x1x128xf32>
    %175 = vector.extract_strided_slice %161 {offsets = [0, 0, 2], sizes = [8, 8, 1], strides = [1, 1, 1]} : vector<8x8x3xf32> to vector<8x8x1xf32>
    %176 = vector.broadcast %175 : vector<8x8x1xf32> to vector<8x8x128xf32>
    %177 = vector.broadcast %174 : vector<1x1x128xf32> to vector<8x8x128xf32>
    %178 = arith.mulf %176, %177 : vector<8x8x128xf32>
    %179 = arith.addf %173, %178 : vector<8x8x128xf32>
    %c0_38 = arith.constant 0 : index
    %c0_39 = arith.constant 0 : index
    %180 = vector.load %arg3[%c0_38, %c0_39] : memref<1x128xf32, #tpu.memory_space<vmem>>, vector<1x128xf32>
    %181 = vector.shape_cast %180 : vector<1x128xf32> to vector<1x1x128xf32>
    %182 = vector.broadcast %181 : vector<1x1x128xf32> to vector<8x8x128xf32>
    %183 = arith.mulf %179, %182 : vector<8x8x128xf32>
    %c0_40 = arith.constant 0 : index
    %c0_41 = arith.constant 0 : index
    %184 = vector.load %arg4[%c0_40, %c0_41] : memref<1x128xf32, #tpu.memory_space<vmem>>, vector<1x128xf32>
    %185 = vector.shape_cast %184 : vector<1x128xf32> to vector<1x1x128xf32>
    %186 = vector.broadcast %185 : vector<1x1x128xf32> to vector<8x8x128xf32>
    %187 = arith.addf %183, %186 : vector<8x8x128xf32>
    %188 = vector.shape_cast %187 : vector<8x8x128xf32> to vector<1x8x8x128xf32>
    %189 = arith.truncf %188 : vector<1x8x8x128xf32> to vector<1x8x8x128xbf16>
    %c0_42 = arith.constant 0 : index
    %c0_43 = arith.constant 0 : index
    %c0_44 = arith.constant 0 : index
    %c0_45 = arith.constant 0 : index
    %190 = vector.load %arg5[%c0_42, %c0_43, %c0_44, %c0_45] : memref<1x8x8x128xbf16, #tpu.memory_space<vmem>>, vector<1x8x8x128xbf16>
    tpu.vector_store %arg5[%c0_42, %c0_43, %c0_44, %c0_45], %189 {strides = array<i32>} : memref<1x8x8x128xbf16, #tpu.memory_space<vmem>>, vector<1x8x8x128xbf16>,
    return
  }
  func.func @transform_0(%arg0: i32) -> (i32, i32, i32, i32) {
    %c0_i32 = arith.constant 0 : i32
    %c0_i32_0 = arith.constant 0 : i32
    %c0_i32_1 = arith.constant 0 : i32
    %c0_i32_2 = arith.constant 0 : i32
    return %arg0, %c0_i32, %c0_i32_0, %c0_i32_1 : i32, i32, i32, i32
  }
  func.func @transform_1(%arg0: i32) -> (i32, i32, i32) {
    %c0_i32 = arith.constant 0 : i32
    %c0_i32_0 = arith.constant 0 : i32
    %c0_i32_1 = arith.constant 0 : i32
    %c0_i32_2 = arith.constant 0 : i32
    return %c0_i32, %c0_i32_0, %c0_i32_1 : i32, i32, i32
  }
  func.func @transform_2(%arg0: i32) -> (i32, i32) {
    %c0_i32 = arith.constant 0 : i32
    %c0_i32_0 = arith.constant 0 : i32
    %c0_i32_1 = arith.constant 0 : i32
    return %c0_i32, %c0_i32_0 : i32, i32
  }
  func.func @transform_3(%arg0: i32) -> (i32, i32) {
    %c0_i32 = arith.constant 0 : i32
    %c0_i32_0 = arith.constant 0 : i32
    %c0_i32_1 = arith.constant 0 : i32
    return %c0_i32, %c0_i32_0 : i32, i32
  }
  func.func @transform_4(%arg0: i32) -> (i32, i32, i32, i32) {
    %c0_i32 = arith.constant 0 : i32
    %c0_i32_0 = arith.constant 0 : i32
    %c0_i32_1 = arith.constant 0 : i32
    %c0_i32_2 = arith.constant 0 : i32
    return %arg0, %c0_i32, %c0_i32_0, %c0_i32_1 : i32, i32, i32, i32
  }
}

</mosaic_0001>

<bundles_post_ra>
// kernel: tpu_custom_call.1
= control target key start
LH: loop header
LB: loop body
LE: loop exit
PB: predicated region body
PF: predicated region fallthrough
CT: control target
= control target key end

     0   :  { %9 = vsyncpa [#allocation4], 0  ;;  %s3807_s0 = inlined_call_operand.vmem [shape: bf16[2,16,16,3], index: 0, kind: input, shape index: {}]   ;;  %s3808_s1 = inlined_call_operand.vmem [shape: bf16[9,3,128], index: 1, kind: input, shape index: {}]   ;;  %s3809_s2 = inlined_call_operand.vmem [shape: f32[1,128], index: 2, kind: input, shape index: {}]   ;;  %s3810_s3 = inlined_call_operand.vmem [shape: f32[1,128], index: 3, kind: input, shape index: {}]   ;;  %s3811_s4 = inlined_call_operand.hbm [shape: bf16[2,8,8,128], index: 4, kind: output, shape index: {}]  }
   0x1   :  { %11 = vsyncpa [#allocation4 + $0x1], 0  ;;  %s2450_s15 = smov 0   ;;  %s2452_s16 = smov 0  }
   0x2   :  { %s2454_s17 = smov 0   ;;  %s2456_s18 = smov 0  }
   0x3 LB: > { %s2471_s19 = sadd.s32 4294967295, %s2416_s18   ;;  %s2153_s20 = sadd.s32 4294967294, %s2416_s18   ;;  %s2416_s18 = sphi %s2456_s18, %s4102_s18   ;;  %s2412_s17 = sphi %s2454_s17, %s4101_s17   ;;  %s2408_s16 = sphi %s2452_s16, %s4100_s16   ;;  %s2404_s15 = sphi %s2450_s15, %s4099_s15  }
   0x4   : > { %s2475_s21 = sadd.s32 1, %s2416_s18   ;;  %s113_s22 = sadd.s32 1, %s2412_s17 }
   0x5   : > { %s110_s23 = ssub.s32 %s2416_s18, %s2475_s21  ;;  %p123_p0 = scmp.ne.s32.totalorder %s2412_s17, %s2408_s16 }
   0x6   : > { %p111_p1 = scmp.eq.s32.totalorder %s110_s23, 0  ;;  %p124_p2 = scmp.eq.s32.totalorder %s2471_s19, 1 }
   0x7   : > { %p129_p3 = scmp.ne.s32.totalorder %s2408_s16, %s2404_s15  ;;  %p130_p4 = scmp.eq.s32.totalorder %s2153_s20, 1 }
   0x8   : > { %s2486_s24 = scalar_select %p111_p1, %s2412_s17, %s113_s22  }
   0x9   : > { %p2488_p5 = por %p124_p2, %p123_p0  ;;  %p2492_p6 = por %p130_p4, %p129_p3 }
   0xa   : > { %p2156_p7 = scmp.ge.s32.totalorder %s2416_s18, 1  ;;  %p165_p8 = scmp.lt.s32.totalorder %s2416_s18, 3 }
   0xc   : > { %p166_p9 = pnand %p2156_p7, %p165_p8 }
   0xe   : > { %169 = sbr.rel (%p166_p9) target bundleno = 709 (0x2c5), region = 36 }
  0x13   : > { %vm196_vm0 = vcmask 23552   ;;  %p191_p10 = scmp.lt.s32.totalorder %s2471_s19, 1  ;;  %vm199_vm1 = vcmask 17408   ;;  %v3816_v0 = vmov 0   ;;  %v2419_v1 = vmov 0.0   ;;  %s188_s9 = sand.u32 1, %s2408_s16  }
  0x14   : > { %2316 = vset.pattern.permute.xlu0 %v3816_v0  ;;  %197 = vst.msk [vmem:[#allocation2] sm:$0xff] %vm196_vm0, %v2419_v1  ;;  %198 = vst.msk [vmem:[#allocation2 + $0x8] sm:$0xff] %vm196_vm0, %v2419_v1  ;;  %2317 = vset.pattern.permute.xlu1 %v3816_v0  ;;  %v3814_v57 = vmov 1   ;;  %v3812_v62 = vmov 2   ;;  %s2157_s12 = sshll.u32 %s188_s9, 5  ;;  %s2168_s14 = sshll.u32 %s2471_s19, 9 }
  0x15   : > { %201 = vst.msk [vmem:[#allocation2 + $0x18] sm:$0xff] %vm196_vm0, %v2419_v1  ;;  %202 = vst.msk [vmem:[#allocation2 + $0x20] sm:$0xff] %vm196_vm0, %v2419_v1  ;;  %s192_s27 = scalar_select %p191_p10, %s2471_s19, 1 }
  0x16   : > { %204 = vst.msk [vmem:[#allocation2 + $0x30] sm:$0xff] %vm196_vm0, %v2419_v1  ;;  %205 = vst.msk [vmem:[#allocation2 + $0x38] sm:$0xff] %vm196_vm0, %v2419_v1  ;;  %s3747_s13 = scalar_lea.vmem [#allocation3], %s2157_s12  ;;  %s2422_s29 = smov [#allocation3]  }
  0x17   : > { %207 = vst.msk [vmem:[#allocation2 + $0x48] sm:$0xff] %vm196_vm0, %v2419_v1  ;;  %208 = vst.msk [vmem:[#allocation2 + $0x50] sm:$0xff] %vm196_vm0, %v2419_v1  ;;  %s2167_s28 = sshll.u32 %s192_s27, 7  ;;  %s2045_s20 = sshll.u32 %s3747_s13, 4  ;;  %s3762_s20 = int_to_ptr.vmem [resolvable:$true] %s2045_s20 }
  0x18   : > { %210 = vst.msk [vmem:[#allocation2 + $0x60] sm:$0xff] %vm196_vm0, %v2419_v1  ;;  %211 = vst.msk [vmem:[#allocation2 + $0x68] sm:$0xff] %vm196_vm0, %v2419_v1  ;;  %s2558_s5 = scalar_lea.vmem %s3807_s0, %s2167_s28  ;;  %s3760_s27 = scalar_lea.hbm %s3811_s4, %s2168_s14 }
  0x19   : > { %213 = vst.msk [vmem:[#allocation2 + $0x78] sm:$0xff] %vm196_vm0, %v2419_v1  ;;  %214 = vst.msk [vmem:[#allocation2 + $0x80] sm:$0xff] %vm196_vm0, %v2419_v1  ;;  %v2255_v2 = vld [vmem:[%s2558_s5 + $0x18] sm:$0xff]   ;;  %v2253_v3 = vld [vmem:[%s2558_s5 + $0x8] sm:$0xff]   ;;  %s3767_s28 = scalar_lea.sflag [#allocation4], %s188_s9  ;;  %s2356_s19 = scalar_lea.vmem %s3762_s20, 512 }
  0x1a   : > { %216 = vst.msk [vmem:[#allocation2 + $0x90] sm:$0xff] %vm196_vm0, %v2419_v1  ;;  %217 = vst.msk [vmem:[#allocation2 + $0x98] sm:$0xff] %vm196_vm0, %v2419_v1  ;;  %v2257_v4 = vld [vmem:[%s2558_s5 + $0x28] sm:$0xff]   ;;  %v2183_v5 = vunpack.c.l.bf16 %v2255_v2  ;;  %v2184_v6 = vunpack.c.h.bf16 %v2255_v2  ;;  %v2175_v7 = vunpack.c.l.bf16 %v2253_v3  ;;  %v2176_v8 = vunpack.c.h.bf16 %v2253_v3  ;;  %v2259_v9 = vld [vmem:[%s2558_s5 + $0x38] sm:$0xff]   ;;  %p2357_p11 = scmp.ne.s32.totalorder %s3762_s20, %s2356_s19  ;;  %s2360_s30 = sshll.u32 %s2422_s29, 4  ;;  %s2361_s30 = int_to_ptr.vmem [resolvable:$false] %s2360_s30 }
  0x1b   : > { %219 = vst.msk [vmem:[#allocation2 + $0xa8] sm:$0xff] %vm196_vm0, %v2419_v1  ;;  %220 = vst.msk [vmem:[#allocation2 + $0xb0] sm:$0xff] %vm196_vm0, %v2419_v1  ;;  %v2261_v10 = vld [vmem:[%s2558_s5 + $0x48] sm:$0xff]   ;;  %v2263_v11 = vld [vmem:[%s2558_s5 + $0x58] sm:$0xff]   ;;  %v2191_v13 = vunpack.c.l.bf16 %v2257_v4  ;;  %v2192_v14 = vunpack.c.h.bf16 %v2257_v4  ;;  %v2199_v15 = vunpack.c.l.bf16 %v2259_v9  ;;  %v2200_v16 = vunpack.c.h.bf16 %v2259_v9  ;;  %p2363_p0 = scmp.lt.s32.totalorder %s3762_s20, %s2361_s30 }
  0x1c   : > { %222 = vst.msk [vmem:[#allocation2 + $0xc0] sm:$0xff] %vm196_vm0, %v2419_v1  ;;  %223 = vst.msk [vmem:[#allocation2 + $0xc8] sm:$0xff] %vm196_vm0, %v2419_v1  ;;  %v2566_v12 = vld [vmem:[#allocation2] ss:$2 sm:$0xff]  ;;  %v2207_v18 = vunpack.c.l.bf16 %v2261_v10  ;;  %v2208_v19 = vunpack.c.h.bf16 %v2261_v10  ;;  %v2215_v20 = vunpack.c.l.bf16 %v2263_v11  ;;  %v2216_v21 = vunpack.c.h.bf16 %v2263_v11  ;;  %v2258_v23 = vld [vmem:[%s2558_s5 + $0x30] sm:$0xff]   ;;  %p2358_p12 = pnand %p2357_p11, %p2488_p5 }
  0x1d   : > { %225 = vst.msk [vmem:[#allocation2 + $0xd8] sm:$0xff] %vm196_vm0, %v2419_v1  ;;  %226 = vst.msk [vmem:[#allocation2 + $0xe0] sm:$0xff] %vm196_vm0, %v2419_v1  ;;  %v2265_v17 = vld [vmem:[%s2558_s5 + $0x68] sm:$0xff]   ;;  %384 = vperm.xlu0 %2316, %v2566_v12   ;;  %v2170_v22 = vld [vmem:[%s2558_s5] sm:$0xff]   ;;  %v2195_v32 = vunpack.c.l.bf16 %v2258_v23  ;;  %v2196_v33 = vunpack.c.h.bf16 %v2258_v23 }
  0x1e   : > { %228 = vst.msk [vmem:[#allocation2 + $0xf0] sm:$0xff] %vm196_vm0, %v2419_v1  ;;  %229 = vst.msk [vmem:[#allocation2 + $0xf8] sm:$0xff] %vm196_vm0, %v2419_v1  ;;  %v2262_v24 = vld [vmem:[%s2558_s5 + $0x50] sm:$0xff]   ;;  %v2223_v25 = vunpack.c.l.bf16 %v2265_v17  ;;  %v2224_v26 = vunpack.c.h.bf16 %v2265_v17  ;;  %v2171_v27 = vunpack.c.l.bf16 %v2170_v22  ;;  %v2172_v28 = vunpack.c.h.bf16 %v2170_v22  ;;  %v2260_v31 = vld [vmem:[%s2558_s5 + $0x40] sm:$0xff]   ;;  %p2359_p13 = pneg %p2358_p12 }
  0x1f   : > { %231 = vst.msk [vmem:[#allocation2 + $0x108] sm:$0xff] %vm196_vm0, %v2419_v1  ;;  %232 = vst.msk [vmem:[#allocation2 + $0x110] sm:$0xff] %vm196_vm0, %v2419_v1  ;;  %v2266_v29 = vld [vmem:[%s2558_s5 + $0x70] sm:$0xff]   ;;  %v2211_v34 = vunpack.c.l.bf16 %v2262_v24  ;;  %v2212_v35 = vunpack.c.h.bf16 %v2262_v24  ;;  %v2264_v36 = vld [vmem:[%s2558_s5 + $0x60] sm:$0xff]   ;;  %v2203_v42 = vunpack.c.l.bf16 %v2260_v31  ;;  %v2204_v43 = vunpack.c.h.bf16 %v2260_v31 }
  0x20   : > { %234 = vst.msk [vmem:[#allocation2 + $0x120] sm:$0xff] %vm196_vm0, %v2419_v1  ;;  %235 = vst.msk [vmem:[#allocation2 + $0x128] sm:$0xff] %vm196_vm0, %v2419_v1  ;;  %v2254_v30 = vld [vmem:[%s2558_s5 + $0x10] sm:$0xff]   ;;  %v2267_v37 = vld [vmem:[%s2558_s5 + $0x78] sm:$0xff]   ;;  %v2227_v38 = vunpack.c.l.bf16 %v2266_v29  ;;  %v2228_v39 = vunpack.c.h.bf16 %v2266_v29  ;;  %v2219_v44 = vunpack.c.l.bf16 %v2264_v36  ;;  %v2220_v45 = vunpack.c.h.bf16 %v2264_v36 }
  0x21   : > { %237 = vst.msk [vmem:[#allocation2 + $0x138] sm:$0xff] %vm196_vm0, %v2419_v1  ;;  %238 = vst.msk [vmem:[#allocation2 + $0x140] sm:$0xff] %vm196_vm0, %v2419_v1  ;;  %v2179_v40 = vunpack.c.l.bf16 %v2254_v30  ;;  %v2180_v41 = vunpack.c.h.bf16 %v2254_v30  ;;  %v2231_v46 = vunpack.c.l.bf16 %v2267_v37  ;;  %v2232_v47 = vunpack.c.h.bf16 %v2267_v37  ;;  %v2625_v55 = vld [vmem:[#allocation2 + $0x1] ss:$2 sm:$0xff] }
  0x22   : > { %240 = vst.msk [vmem:[#allocation2 + $0x150] sm:$0xff] %vm196_vm0, %v2419_v1  ;;  %241 = vst.msk [vmem:[#allocation2 + $0x158] sm:$0xff] %vm196_vm0, %v2419_v1 }
  0x23   : > { %243 = vst.msk [vmem:[#allocation2 + $0x168] sm:$0xff] %vm196_vm0, %v2419_v1  ;;  %244 = vst.msk [vmem:[#allocation2 + $0x170] sm:$0xff] %vm196_vm0, %v2419_v1 }
  0x24   : > { %246 = vst.msk [vmem:[#allocation2 + $0x180] sm:$0xff] %vm196_vm0, %v2419_v1  ;;  %247 = vst.msk [vmem:[#allocation2 + $0x188] sm:$0xff] %vm196_vm0, %v2419_v1 }
  0x25   : > { %212 = vst.msk [vmem:[#allocation2 + $0x70] sm:$0x3] %vm199_vm1, %v2419_v1  ;;  %200 = vst.msk [vmem:[#allocation2 + $0x10] sm:$0x3] %vm199_vm1, %v2419_v1 }
  0x26   : > { %203 = vst.msk [vmem:[#allocation2 + $0x28] sm:$0x3] %vm199_vm1, %v2419_v1  ;;  %206 = vst.msk [vmem:[#allocation2 + $0x40] sm:$0x3] %vm199_vm1, %v2419_v1 }
  0x27   : > { %209 = vst.msk [vmem:[#allocation2 + $0x58] sm:$0x3] %vm199_vm1, %v2419_v1  ;;  %215 = vst.msk [vmem:[#allocation2 + $0x88] sm:$0x3] %vm199_vm1, %v2419_v1 }
  0x28   : > { %218 = vst.msk [vmem:[#allocation2 + $0xa0] sm:$0x3] %vm199_vm1, %v2419_v1  ;;  %221 = vst.msk [vmem:[#allocation2 + $0xb8] sm:$0x3] %vm199_vm1, %v2419_v1 }
  0x29   : > { %224 = vst.msk [vmem:[#allocation2 + $0xd0] sm:$0x3] %vm199_vm1, %v2419_v1  ;;  %227 = vst.msk [vmem:[#allocation2 + $0xe8] sm:$0x3] %vm199_vm1, %v2419_v1 }
  0x2a   : > { %230 = vst.msk [vmem:[#allocation2 + $0x100] sm:$0x3] %vm199_vm1, %v2419_v1  ;;  %233 = vst.msk [vmem:[#allocation2 + $0x118] sm:$0x3] %vm199_vm1, %v2419_v1 }
  0x2b   : > { %236 = vst.msk [vmem:[#allocation2 + $0x130] sm:$0x3] %vm199_vm1, %v2419_v1  ;;  %239 = vst.msk [vmem:[#allocation2 + $0x148] sm:$0x3] %vm199_vm1, %v2419_v1 }
  0x2c   : > { %242 = vst.msk [vmem:[#allocation2 + $0x160] sm:$0x3] %vm199_vm1, %v2419_v1  ;;  %245 = vst.msk [vmem:[#allocation2 + $0x178] sm:$0x3] %vm199_vm1, %v2419_v1 }
  0x2d   : > { %248 = vst.msk [vmem:[#allocation2 + $0x190] sm:$0x3] %vm199_vm1, %v2419_v1  ;;  %v2256_v1 = vld [vmem:[%s2558_s5 + $0x20] sm:$0xff]   ;;  %s2362_s5 = scalar_lea.vmem %s2361_s30, 1024 }
  0x2e   : > { %323 = vst.msk [vmem:[#allocation2 + $0x61] sm:$0xff] %vm196_vm0, %v2183_v5  ;;  %324 = vst.msk [vmem:[#allocation2 + $0x69] sm:$0xff] %vm196_vm0, %v2184_v6  ;;  %v2187_v2 = vunpack.c.l.bf16 %v2256_v1  ;;  %v2188_v3 = vunpack.c.h.bf16 %v2256_v1  ;;  %p2364_p1 = scmp.lt.s32.totalorder %s2362_s5, %s2356_s19 }
  0x2f   : > { %319 = vst.msk [vmem:[#allocation2 + $0x31] sm:$0xff] %vm196_vm0, %v2175_v7  ;;  %320 = vst.msk [vmem:[#allocation2 + $0x39] sm:$0xff] %vm196_vm0, %v2176_v8 }
  0x30   : > { %327 = vst.msk [vmem:[#allocation2 + $0x91] sm:$0xff] %vm196_vm0, %v2191_v13  ;;  %328 = vst.msk [vmem:[#allocation2 + $0x99] sm:$0xff] %vm196_vm0, %v2192_v14  ;;  %p2365_p2 = por %p2364_p1, %p2363_p0 }
  0x31   : > { %331 = vst.msk [vmem:[#allocation2 + $0xc1] sm:$0xff] %vm196_vm0, %v2199_v15  ;;  %332 = vst.msk [vmem:[#allocation2 + $0xc9] sm:$0xff] %vm196_vm0, %v2200_v16 }
  0x32   : > { %335 = vst.msk [vmem:[#allocation2 + $0xf1] sm:$0xff] %vm196_vm0, %v2207_v18  ;;  %336 = vst.msk [vmem:[#allocation2 + $0xf9] sm:$0xff] %vm196_vm0, %v2208_v19  ;;  %p2366_p3 = pnand %p2365_p2, %p2359_p13 }
  0x33   : > { %339 = vst.msk [vmem:[#allocation2 + $0x121] sm:$0xff] %vm196_vm0, %v2215_v20  ;;  %340 = vst.msk [vmem:[#allocation2 + $0x129] sm:$0xff] %vm196_vm0, %v2216_v21 }
  0x34   : > { %343 = vst.msk [vmem:[#allocation2 + $0x151] sm:$0xff] %vm196_vm0, %v2223_v25  ;;  %344 = vst.msk [vmem:[#allocation2 + $0x159] sm:$0xff] %vm196_vm0, %v2224_v26 }
  0x35   : > { %317 = vst.msk [vmem:[#allocation2 + $0x19] sm:$0xff] %vm196_vm0, %v2171_v27  ;;  %318 = vst.msk [vmem:[#allocation2 + $0x21] sm:$0xff] %vm196_vm0, %v2172_v28  ;;  %v371_v48 = vld [vmem:[#allocation2 + $0x60] ss:$2 sm:$0xff]  ;;  %v551_v10 = vld [vmem:[#allocation2 + $0x61] ss:$2 sm:$0xff] }
  0x36   : > { %329 = vst.msk [vmem:[#allocation2 + $0xa9] sm:$0xff] %vm196_vm0, %v2195_v32  ;;  %330 = vst.msk [vmem:[#allocation2 + $0xb1] sm:$0xff] %vm196_vm0, %v2196_v33  ;;  %v2606_v49 = vld [vmem:[#allocation2 + $0x30] ss:$2 sm:$0xff]  ;;  %394 = vperm.xlu1 %2317, %v371_v48   ;;  %v2671_v8 = vld [vmem:[#allocation2 + $0x31] ss:$2 sm:$0xff] }
  0x37   : > { %337 = vst.msk [vmem:[#allocation2 + $0x109] sm:$0xff] %vm196_vm0, %v2211_v34  ;;  %338 = vst.msk [vmem:[#allocation2 + $0x111] sm:$0xff] %vm196_vm0, %v2212_v35  ;;  %389 = vperm.xlu0 %2316, %v2606_v49   ;;  %v2611_v50 = vld [vmem:[#allocation2 + $0x90] ss:$2 sm:$0xff]  ;;  %v2629_v56 = vld [vmem:[#allocation2 + $0x91] ss:$2 sm:$0xff] }
  0x38   : > { %345 = vst.msk [vmem:[#allocation2 + $0x169] sm:$0xff] %vm196_vm0, %v2227_v38  ;;  %346 = vst.msk [vmem:[#allocation2 + $0x171] sm:$0xff] %vm196_vm0, %v2228_v39  ;;  %v2613_v51 = vld [vmem:[#allocation2 + $0xc0] ss:$2 sm:$0xff]  ;;  %v2681_v13 = vld [vmem:[#allocation2 + $0xc1] ss:$2 sm:$0xff] }
  0x39   : > { %321 = vst.msk [vmem:[#allocation2 + $0x49] sm:$0xff] %vm196_vm0, %v2179_v40  ;;  %322 = vst.msk [vmem:[#allocation2 + $0x51] sm:$0xff] %vm196_vm0, %v2180_v41  ;;  %v2617_v52 = vld [vmem:[#allocation2 + $0xf0] ss:$2 sm:$0xff]  ;;  %v2634_v58 = vld [vmem:[#allocation2 + $0xf1] ss:$2 sm:$0xff] }
  0x3a   : > { %333 = vst.msk [vmem:[#allocation2 + $0xd9] sm:$0xff] %vm196_vm0, %v2203_v42  ;;  %334 = vst.msk [vmem:[#allocation2 + $0xe1] sm:$0xff] %vm196_vm0, %v2204_v43  ;;  %399 = vperm.xlu1 %2317, %v2611_v50   ;;  %v2619_v53 = vld [vmem:[#allocation2 + $0x120] ss:$2 sm:$0xff]  ;;  %v2687_v15 = vld [vmem:[#allocation2 + $0x121] ss:$2 sm:$0xff] }
  0x3b   : > { %341 = vst.msk [vmem:[#allocation2 + $0x139] sm:$0xff] %vm196_vm0, %v2219_v44  ;;  %342 = vst.msk [vmem:[#allocation2 + $0x141] sm:$0xff] %vm196_vm0, %v2220_v45  ;;  %404 = vperm.xlu0 %2316, %v2613_v51   ;;  %v2623_v54 = vld [vmem:[#allocation2 + $0x150] ss:$2 sm:$0xff]  ;;  %v2637_v59 = vld [vmem:[#allocation2 + $0x151] ss:$2 sm:$0xff] }
  0x3c   : > { %347 = vst.msk [vmem:[#allocation2 + $0x181] sm:$0xff] %vm196_vm0, %v2231_v46  ;;  %348 = vst.msk [vmem:[#allocation2 + $0x189] sm:$0xff] %vm196_vm0, %v2232_v47  ;;  %v2641_v60 = vld [vmem:[#allocation2 + $0x32] ss:$2 sm:$0xff]  ;;  %v2645_v61 = vld [vmem:[#allocation2 + $0xc2] ss:$2 sm:$0xff] }
  0x3d   : > { %v2649_v63 = vld [vmem:[#allocation2 + $0x122] ss:$2 sm:$0xff]  ;;  %325 = vst.msk [vmem:[#allocation2 + $0x79] sm:$0xff] %vm196_vm0, %v2187_v2  ;;  %326 = vst.msk [vmem:[#allocation2 + $0x81] sm:$0xff] %vm196_vm0, %v2188_v3  ;;  %v2718_v23 = vld [vmem:[#allocation2 + $0x31] ss:$2 sm:$0xff] }
  0x3e   : > { %409 = vperm.xlu1 %2317, %v2617_v52   ;;  %v2654_v4 = vld [vmem:[#allocation2 + $0x18] ss:$2 sm:$0xff]  ;;  %v2659_v5 = vld [vmem:[#allocation2 + $0xa8] ss:$2 sm:$0xff]  ;;  %3839 = vst [vmem:[#allocation6_spill] sm:$0xff] %v2718_v23 }
  0x3f   : > { %414 = vperm.xlu0 %2316, %v2619_v53   ;;  %v2663_v6 = vld [vmem:[#allocation2 + $0x108] ss:$2 sm:$0xff]  ;;  %v2721_v24 = vld [vmem:[#allocation2 + $0xc1] ss:$2 sm:$0xff] }
  0x40   : > { %v2667_v7 = vld [vmem:[#allocation2 + $0x168] ss:$2 sm:$0xff]  ;;  %v2673_v9 = vld [vmem:[#allocation2 + $0x49] ss:$2 sm:$0xff] }
  0x41   : > { %v2678_v11 = vld [vmem:[#allocation2 + $0xd9] ss:$2 sm:$0xff]  ;;  %v2689_v16 = vld [vmem:[#allocation2 + $0x1a] ss:$2 sm:$0xff]  ;;  %v2693_v17 = vld [vmem:[#allocation2 + $0xaa] ss:$2 sm:$0xff] }
  0x42   : > { %419 = vperm.xlu1 %2317, %v2623_v54   ;;  %v2683_v14 = vld [vmem:[#allocation2 + $0x139] ss:$2 sm:$0xff]  ;;  %v2698_v18 = vld [vmem:[#allocation2 + $0x10a] ss:$2 sm:$0xff] }
  0x43   : > { %564 = vperm.xlu0 %2316, %v2625_v55   ;;  %v2701_v19 = vld [vmem:[#allocation2 + $0x16a] ss:$2 sm:$0xff]  ;;  %v2725_v25 = vld [vmem:[#allocation2 + $0x121] ss:$2 sm:$0xff] }
  0x44   : > { %v2705_v20 = vld [vmem:[#allocation2 + $0x60] ss:$2 sm:$0xff]  ;;  %v2709_v21 = vld [vmem:[#allocation2 + $0xf0] ss:$2 sm:$0xff]  ;;  %v2729_v26 = vld [vmem:[#allocation2 + $0x181] ss:$2 sm:$0xff] }
  0x45   : > { %v2713_v22 = vld [vmem:[#allocation2 + $0x150] ss:$2 sm:$0xff] }
  0x46   : > { %2318 = vset.pattern.permute.xlu1 %v3814_v57  ;;  %v727_v27 = vld [vmem:[#allocation2 + $0x2] ss:$2 sm:$0xff]  ;;  %v2736_v30 = vld [vmem:[#allocation2 + $0xf2] ss:$2 sm:$0xff] }
  0x47   : > { %579 = vperm.xlu0 %2316, %v2629_v56   ;;  %447 = vperm.xlu1 %2318, %v2606_v49   ;;  %v2733_v28 = vld [vmem:[#allocation2 + $0x62] ss:$2 sm:$0xff]  ;;  %v733_v31 = vld [vmem:[#allocation2 + $0x92] ss:$2 sm:$0xff] }
  0x48   : > { %v731_v29 = vld [vmem:[#allocation2 + $0x62] ss:$2 sm:$0xff]  ;;  %v2741_v33 = vld [vmem:[#allocation2 + $0x152] ss:$2 sm:$0xff] }
  0x49   : > { %v737_v34 = vld [vmem:[#allocation2 + $0xf2] ss:$2 sm:$0xff] }
  0x4a   : > { %v741_v37 = vld [vmem:[#allocation2 + $0x152] ss:$2 sm:$0xff] }
  0x4b   : > { %589 = vperm.xlu0 %2316, %v2634_v58   ;;  %451 = vperm.xlu1 %2318, %v371_v48  }
  0x4f   : > { %599 = vperm.xlu0 %2316, %v2637_v59   ;;  %459 = vperm.xlu1 %2318, %v2613_v51  }
  0x53   : > { %749 = vperm.xlu0 %2316, %v2641_v60   ;;  %467 = vperm.xlu1 %2318, %v2619_v53  }
  0x57   : > { %764 = vperm.xlu0 %2316, %v2645_v61   ;;  %2319 = vset.pattern.permute.xlu1 %v3812_v62 }
  0x58   : > { %495 = vperm.xlu1 %2319, %v2566_v12  }
  0x5b   : > { %774 = vperm.xlu0 %2316, %v2649_v63  }
  0x5c   : > { %503 = vperm.xlu1 %2319, %v371_v48  }
  0x5f   : > { %923 = vperm.xlu0 %2316, %v2654_v4  }
  0x60   : > { %507 = vperm.xlu1 %2319, %v2611_v50  }
  0x63   : > { %938 = vperm.xlu0 %2316, %v2659_v5  }
  0x64   : > { %515 = vperm.xlu1 %2319, %v2617_v52  }
  0x67   : > { %948 = vperm.xlu0 %2316, %v2663_v6  }
  0x68   : > { %523 = vperm.xlu1 %2319, %v2623_v54  }
  0x6b   : > { %958 = vperm.xlu0 %2316, %v2667_v7  }
  0x6c   : > { %2320 = vset.pattern.permute.xlu1 %v3816_v0 }
  0x6d   : > { %569 = vperm.xlu1 %2320, %v2671_v8  }
  0x6f   : > { %1108 = vperm.xlu0 %2316, %v2673_v9  }
  0x71   : > { %574 = vperm.xlu1 %2320, %v551_v10  }
  0x73   : > { %1123 = vperm.xlu0 %2316, %v2678_v11  }
  0x75   : > { %584 = vperm.xlu1 %2320, %v2681_v13  }
  0x77   : > { %1133 = vperm.xlu0 %2316, %v2683_v14  }
  0x79   : > { %594 = vperm.xlu1 %2320, %v2687_v15  }
  0x7b   : > { %1283 = vperm.xlu0 %2316, %v2689_v16  }
  0x7d   : > { %2321 = vset.pattern.permute.xlu1 %v3814_v57 }
  0x7e   : > { %623 = vperm.xlu1 %2321, %v2625_v55  }
  0x7f   : > { %1298 = vperm.xlu0 %2316, %v2693_v17  }
  0x82   : > { %631 = vperm.xlu1 %2321, %v551_v10  }
  0x83   : > { %1308 = vperm.xlu0 %2316, %v2698_v18  }
  0x86   : > { %635 = vperm.xlu1 %2321, %v2629_v56  }
  0x87   : > { %1318 = vperm.xlu0 %2316, %v2701_v19  }
  0x8a   : > { %643 = vperm.xlu1 %2321, %v2634_v58  }
  0x8b   : > { %1468 = vperm.xlu0 %2316, %v2705_v20  }
  0x8e   : > { %651 = vperm.xlu1 %2321, %v2637_v59  }
  0x8f   : > { %1483 = vperm.xlu0 %2316, %v2709_v21  }
  0x92   : > { %2322 = vset.pattern.permute.xlu1 %v3812_v62 }
  0x93   : > { %1493 = vperm.xlu0 %2316, %v2713_v22   ;;  %679 = vperm.xlu1 %2322, %v2671_v8  }
  0x97   : > { %1643 = vperm.xlu0 %2316, %v2718_v23   ;;  %683 = vperm.xlu1 %2322, %v551_v10  }
  0x98   : > { %v2739_v32 = vpop.permute.xlu0 %384 }
  0x9b   : > { %1658 = vperm.xlu0 %2316, %v2721_v24   ;;  %691 = vperm.xlu1 %2322, %v2681_v13  }
  0x9f   : > { %1668 = vperm.xlu0 %2316, %v2725_v25   ;;  %699 = vperm.xlu1 %2322, %v2687_v15  }
  0xa3   : > { %1678 = vperm.xlu0 %2316, %v2729_v26   ;;  %2323 = vset.pattern.permute.xlu1 %v3816_v0 }
  0xa4   : > { %744 = vperm.xlu1 %2323, %v727_v27  }
  0xa7   : > { %1828 = vperm.xlu0 %2316, %v2733_v28  }
  0xa8   : > { %754 = vperm.xlu1 %2323, %v731_v29  }
  0xab   : > { %1843 = vperm.xlu0 %2316, %v2736_v30  }
  0xac   : > { %759 = vperm.xlu1 %2323, %v733_v31  }
  0xaf   : > { %1853 = vperm.xlu0 %2316, %v2741_v33  }
  0xb0   : > { %769 = vperm.xlu1 %2323, %v737_v34  }
  0xb1   : > { %v2744_v35 = vpop.permute.xlu1 %394 }
  0xb2   : > { %v2746_v36 = vpop.permute.xlu0 %389 }
  0xb3   : > { %2342 = vset.pattern.permute.xlu0 %v3814_v57 }
  0xb4   : > { %443 = vperm.xlu0 %2342, %v2566_v12   ;;  %779 = vperm.xlu1 %2323, %v741_v37  }
  0xb5   : > { %v2750_v38 = vpop.permute.xlu1 %399 }
  0xb6   : > { %v2752_v39 = vpop.permute.xlu0 %404 }
  0xb8   : > { %455 = vperm.xlu0 %2342, %v2611_v50   ;;  %2324 = vset.pattern.permute.xlu1 %v3814_v57  ;;  %v918_v57 = vld [vmem:[#allocation2 + $0x138] ss:$2 sm:$0xff] }
  0xb9   : > { %v2756_v40 = vpop.permute.xlu1 %409  ;;  %807 = vperm.xlu1 %2324, %v2641_v60  }
  0xba   : > { %3840 = vst [vmem:[#allocation7_spill] sm:$0xff] %v2756_v40  ;;  %v2759_v41 = vpop.permute.xlu0 %414 }
  0xbc   : > { %463 = vperm.xlu0 %2342, %v2617_v52  }
  0xbd   : > { %v2762_v42 = vpop.permute.xlu1 %419  ;;  %811 = vperm.xlu1 %2324, %v731_v29  }
  0xbe   : > { %3841 = vst [vmem:[#allocation8_spill] sm:$0xff] %v2762_v42  ;;  %v2764_v12 = vpop.permute.xlu0 %564  ;;  %v2911_v42 = vld [vmem:[#allocation2 + $0x151] ss:$2 sm:$0xff] }
  0xbf   : > { %3842 = vst [vmem:[#allocation9_spill] sm:$0xff] %v2764_v12  ;;  %3890 = vst [vmem:[#allocation54_spill] sm:$0xff] %v2911_v42 }
  0xc0   : > { %471 = vperm.xlu0 %2342, %v2623_v54  }
  0xc1   : > { %819 = vperm.xlu1 %2324, %v2645_v61  }
  0xc2   : > { %v2768_v43 = vpop.permute.xlu0 %579  ;;  %v2770_v44 = vpop.permute.xlu1 %447 }
  0xc3   : > { %3843 = vst [vmem:[#allocation10_spill] sm:$0xff] %v2768_v43 }
  0xc4   : > { %627 = vperm.xlu0 %2342, %v2671_v8  }
  0xc5   : > { %827 = vperm.xlu1 %2324, %v2649_v63  }
  0xc6   : > { %v2774_v45 = vpop.permute.xlu0 %589  ;;  %v2776_v46 = vpop.permute.xlu1 %451 }
  0xc7   : > { %3844 = vst [vmem:[#allocation11_spill] sm:$0xff] %v2774_v45  ;;  %v2867_v45 = vld [vmem:[#allocation2 + $0x30] ss:$2 sm:$0xff] }
  0xc8   : > { %639 = vperm.xlu0 %2342, %v2681_v13   ;;  %v908_v13 = vld [vmem:[#allocation2 + $0x48] ss:$2 sm:$0xff] }
  0xc9   : > { %2325 = vset.pattern.permute.xlu1 %v3812_v62 }
  0xca   : > { %v2780_v47 = vpop.permute.xlu0 %599  ;;  %855 = vperm.xlu1 %2325, %v727_v27   ;;  %v2782_v48 = vpop.permute.xlu1 %459 }
  0xcb   : > { %3845 = vst [vmem:[#allocation12_spill] sm:$0xff] %v2780_v47 }
  0xcc   : > { %647 = vperm.xlu0 %2342, %v2687_v15  }
  0xce   : > { %v2785_v50 = vpop.permute.xlu0 %749  ;;  %863 = vperm.xlu1 %2325, %v731_v29   ;;  %v2787_v52 = vpop.permute.xlu1 %467  ;;  %v910_v29 = vld [vmem:[#allocation2 + $0x78] ss:$2 sm:$0xff] }
  0xcf   : > { %3846 = vst [vmem:[#allocation13_spill] sm:$0xff] %v2785_v50  ;;  %3847 = vst [vmem:[#allocation14_spill] sm:$0xff] %v2787_v52 }
  0xd0   : > { %803 = vperm.xlu0 %2342, %v727_v27  }
  0xd2   : > { %v2789_v54 = vpop.permute.xlu0 %764  ;;  %867 = vperm.xlu1 %2325, %v733_v31  }
  0xd3   : > { %3848 = vst [vmem:[#allocation15_spill] sm:$0xff] %v2789_v54  ;;  %v2791_v1 = vpop.permute.xlu1 %495 }
  0xd4   : > { %3849 = vst [vmem:[#allocation16_spill] sm:$0xff] %v2791_v1  ;;  %815 = vperm.xlu0 %2342, %v733_v31   ;;  %v914_v31 = vld [vmem:[#allocation2 + $0xd8] ss:$2 sm:$0xff] }
  0xd6   : > { %v2793_v2 = vpop.permute.xlu0 %774  ;;  %875 = vperm.xlu1 %2325, %v737_v34  }
  0xd7   : > { %3850 = vst [vmem:[#allocation17_spill] sm:$0xff] %v2793_v2  ;;  %v2795_v3 = vpop.permute.xlu1 %503 }
  0xd8   : > { %3851 = vst [vmem:[#allocation18_spill] sm:$0xff] %v2795_v3  ;;  %823 = vperm.xlu0 %2342, %v737_v34  }
  0xda   : > { %v2797_v8 = vpop.permute.xlu0 %923  ;;  %883 = vperm.xlu1 %2325, %v741_v37  }
  0xdb   : > { %3852 = vst [vmem:[#allocation19_spill] sm:$0xff] %v2797_v8  ;;  %v2799_v10 = vpop.permute.xlu1 %507  ;;  %v3863_v8 = vmov 1  }
  0xdc   : > { %3853 = vst [vmem:[#allocation20_spill] sm:$0xff] %v2799_v10  ;;  %831 = vperm.xlu0 %2342, %v741_v37  }
  0xde   : > { %v2801_v15 = vpop.permute.xlu0 %938  ;;  %2326 = vset.pattern.permute.xlu1 %v3816_v0  ;;  %v2814_v0 = vld [vmem:[#allocation2 + $0x19] ss:$2 sm:$0xff] }
  0xdf   : > { %3854 = vst [vmem:[#allocation21_spill] sm:$0xff] %v2801_v15  ;;  %928 = vperm.xlu1 %2326, %v908_v13   ;;  %v2804_v27 = vpop.permute.xlu1 %515 }
  0xe0   : > { %3855 = vst [vmem:[#allocation22_spill] sm:$0xff] %v2804_v27  ;;  %986 = vperm.xlu0 %2342, %v908_v13  }
  0xe2   : > { %v2806_v62 = vpop.permute.xlu0 %948 }
  0xe3   : > { %3856 = vst [vmem:[#allocation23_spill] sm:$0xff] %v2806_v62  ;;  %933 = vperm.xlu1 %2326, %v910_v29   ;;  %v2808_v34 = vpop.permute.xlu1 %523  ;;  %v2821_v62 = vld [vmem:[#allocation2 + $0xa9] ss:$2 sm:$0xff] }
  0xe4   : > { %3857 = vst [vmem:[#allocation24_spill] sm:$0xff] %v2808_v34  ;;  %998 = vperm.xlu0 %2342, %v914_v31  }
  0xe6   : > { %v2810_v10 = vpop.permute.xlu0 %958 }
  0xe7   : > { %3858 = vst [vmem:[#allocation25_spill] sm:$0xff] %v2810_v10  ;;  %943 = vperm.xlu1 %2326, %v914_v31  }
  0xe8   : > { %1006 = vperm.xlu0 %2342, %v918_v57   ;;  %v2812_v37 = vpop.permute.xlu1 %569 }
  0xe9   : > { %3859 = vst [vmem:[#allocation26_spill] sm:$0xff] %v2812_v37  ;;  %v2830_v37 = vld [vmem:[#allocation2 + $0x109] ss:$2 sm:$0xff] }
  0xea   : > { %v2816_v15 = vpop.permute.xlu0 %1108 }
  0xeb   : > { %3860 = vst [vmem:[#allocation27_spill] sm:$0xff] %v2816_v15  ;;  %953 = vperm.xlu1 %2326, %v918_v57  }
  0xec   : > { %1162 = vperm.xlu0 %2342, %v2814_v0   ;;  %v2819_v27 = vpop.permute.xlu1 %574 }
  0xed   : > { %3861 = vst [vmem:[#allocation28_spill] sm:$0xff] %v2819_v27  ;;  %v2837_v27 = vld [vmem:[#allocation2 + $0x169] ss:$2 sm:$0xff] }
  0xee   : > { %v2823_v34 = vpop.permute.xlu0 %1123 }
  0xef   : > { %3862 = vst [vmem:[#allocation29_spill] sm:$0xff] %v2823_v34  ;;  %2327 = vset.pattern.permute.xlu1 %v3863_v8 }
  0xf0   : > { %1174 = vperm.xlu0 %2342, %v2821_v62   ;;  %v2827_v10 = vpop.permute.xlu1 %584  ;;  %982 = vperm.xlu1 %2327, %v2654_v4  }
  0xf1   : > { %3864 = vst [vmem:[#allocation30_spill] sm:$0xff] %v2827_v10  ;;  %v2843_v10 = vld [vmem:[#allocation2 + $0x4a] ss:$2 sm:$0xff] }
  0xf2   : > { %v2832_v15 = vpop.permute.xlu0 %1133 }
  0xf3   : > { %3865 = vst [vmem:[#allocation31_spill] sm:$0xff] %v2832_v15 }
  0xf4   : > { %1182 = vperm.xlu0 %2342, %v2830_v37   ;;  %v2835_v2 = vpop.permute.xlu1 %594  ;;  %990 = vperm.xlu1 %2327, %v910_v29  }
  0xf5   : > { %3866 = vst [vmem:[#allocation32_spill] sm:$0xff] %v2835_v2  ;;  %v2851_v2 = vld [vmem:[#allocation2 + $0xda] ss:$2 sm:$0xff] }
  0xf6   : > { %v2839_v34 = vpop.permute.xlu0 %1283 }
  0xf7   : > { %3867 = vst [vmem:[#allocation33_spill] sm:$0xff] %v2839_v34  ;;  %v2859_v34 = vld [vmem:[#allocation2 + $0x13a] ss:$2 sm:$0xff] }
  0xf8   : > { %1190 = vperm.xlu0 %2342, %v2837_v27   ;;  %994 = vperm.xlu1 %2327, %v2659_v5  }
  0xf9   : > { %v2845_v1 = vpop.permute.xlu1 %623 }
  0xfa   : > { %3868 = vst [vmem:[#allocation34_spill] sm:$0xff] %v2845_v1  ;;  %v2847_v54 = vpop.permute.xlu0 %1298 }
  0xfb   : > { %3869 = vst [vmem:[#allocation35_spill] sm:$0xff] %v2847_v54  ;;  %v3874_v54 = vmov 2  }
  0xfc   : > { %1346 = vperm.xlu0 %2342, %v2843_v10   ;;  %1002 = vperm.xlu1 %2327, %v2663_v6  }
  0xfd   : > { %v2853_v15 = vpop.permute.xlu1 %631 }
  0xfe   : > { %3870 = vst [vmem:[#allocation36_spill] sm:$0xff] %v2853_v15  ;;  %v2855_v50 = vpop.permute.xlu0 %1308  ;;  %v2874_v15 = vld [vmem:[#allocation2 + $0xc0] ss:$2 sm:$0xff] }
  0xff   : > { %3871 = vst [vmem:[#allocation37_spill] sm:$0xff] %v2855_v50 }
 0x100   : > { %1358 = vperm.xlu0 %2342, %v2851_v2   ;;  %1010 = vperm.xlu1 %2327, %v2667_v7  }
 0x101   : > { %v2861_v47 = vpop.permute.xlu1 %635 }
 0x102   : > { %3872 = vst [vmem:[#allocation38_spill] sm:$0xff] %v2861_v47  ;;  %v2863_v1 = vpop.permute.xlu0 %1318 }
 0x103   : > { %3873 = vst [vmem:[#allocation39_spill] sm:$0xff] %v2863_v1  ;;  %v2881_v1 = vld [vmem:[#allocation2 + $0x120] ss:$2 sm:$0xff] }
 0x104   : > { %1366 = vperm.xlu0 %2342, %v2859_v34   ;;  %2328 = vset.pattern.permute.xlu1 %v3874_v54 }
 0x105   : > { %v2869_v43 = vpop.permute.xlu1 %643  ;;  %1038 = vperm.xlu1 %2328, %v908_v13   ;;  %v2888_v13 = vld [vmem:[#allocation2 + $0x180] ss:$2 sm:$0xff] }
 0x106   : > { %3875 = vst [vmem:[#allocation40_spill] sm:$0xff] %v2869_v43  ;;  %v2871_v50 = vpop.permute.xlu0 %1468 }
 0x107   : > { %3876 = vst [vmem:[#allocation41_spill] sm:$0xff] %v2871_v50 }
 0x108   : > { %1522 = vperm.xlu0 %2342, %v2867_v45  }
 0x109   : > { %v2876_v3 = vpop.permute.xlu1 %651  ;;  %1042 = vperm.xlu1 %2328, %v910_v29   ;;  %v2895_v29 = vld [vmem:[#allocation2 + $0x61] ss:$2 sm:$0xff] }
 0x10a   : > { %3877 = vst [vmem:[#allocation42_spill] sm:$0xff] %v2876_v3  ;;  %v2878_v47 = vpop.permute.xlu0 %1483  ;;  %3883 = vst [vmem:[#allocation48_spill] sm:$0xff] %v2895_v29 }
 0x10b   : > { %3878 = vst [vmem:[#allocation43_spill] sm:$0xff] %v2878_v47  ;;  %v3884_v47 = vmov 0  }
 0x10c   : > { %1534 = vperm.xlu0 %2342, %v2874_v15  }
 0x10d   : > { %1050 = vperm.xlu1 %2328, %v914_v31  }
 0x10e   : > { %v2883_v12 = vpop.permute.xlu0 %1493  ;;  %v2885_v43 = vpop.permute.xlu1 %679 }
 0x10f   : > { %3879 = vst [vmem:[#allocation44_spill] sm:$0xff] %v2883_v12  ;;  %3880 = vst [vmem:[#allocation45_spill] sm:$0xff] %v2885_v43  ;;  %v1090_v43 = vld [vmem:[#allocation2 + $0x79] ss:$2 sm:$0xff] }
 0x110   : > { %1542 = vperm.xlu0 %2342, %v2881_v1  }
 0x111   : > { %1058 = vperm.xlu1 %2328, %v918_v57   ;;  %v2904_v57 = vld [vmem:[#allocation2 + $0xf1] ss:$2 sm:$0xff] }
 0x112   : > { %v2890_v50 = vpop.permute.xlu0 %1643  ;;  %v2892_v3 = vpop.permute.xlu1 %683  ;;  %3887 = vst [vmem:[#allocation51_spill] sm:$0xff] %v2904_v57 }
 0x113   : > { %3881 = vst [vmem:[#allocation46_spill] sm:$0xff] %v2890_v50  ;;  %3882 = vst [vmem:[#allocation47_spill] sm:$0xff] %v2892_v3 }
 0x114   : > { %1550 = vperm.xlu0 %2342, %v2888_v13  }
 0x115   : > { %2329 = vset.pattern.permute.xlu1 %v3884_v47 }
 0x116   : > { %v2898_v31 = vpop.permute.xlu0 %1658  ;;  %v2900_v12 = vpop.permute.xlu1 %691  ;;  %1103 = vperm.xlu1 %2329, %v2814_v0  }
 0x117   : > { %3885 = vst [vmem:[#allocation49_spill] sm:$0xff] %v2898_v31  ;;  %3886 = vst [vmem:[#allocation50_spill] sm:$0xff] %v2900_v12  ;;  %v2919_v12 = vld [vmem:[#allocation2 + $0x32] ss:$2 sm:$0xff] }
 0x118   : > { %1706 = vperm.xlu0 %2342, %v2895_v29   ;;  %3893 = vst [vmem:[#allocation57_spill] sm:$0xff] %v2919_v12 }
 0x11a   : > { %v2906_v50 = vpop.permute.xlu0 %1668  ;;  %v2908_v3 = vpop.permute.xlu1 %699  ;;  %1113 = vperm.xlu1 %2329, %v1090_v43  }
 0x11b   : > { %3888 = vst [vmem:[#allocation52_spill] sm:$0xff] %v2906_v50  ;;  %3889 = vst [vmem:[#allocation53_spill] sm:$0xff] %v2908_v3 }
 0x11c   : > { %1718 = vperm.xlu0 %2342, %v2904_v57   ;;  %v1812_v57 = vld [vmem:[#allocation2 + $0xc2] ss:$2 sm:$0xff] }
 0x11e   : > { %v2913_v40 = vpop.permute.xlu0 %1678  ;;  %1118 = vperm.xlu1 %2329, %v2821_v62  }
 0x11f   : > { %3891 = vst [vmem:[#allocation55_spill] sm:$0xff] %v2913_v40  ;;  %v2916_v31 = vpop.permute.xlu1 %744 }
 0x120   : > { %3892 = vst [vmem:[#allocation56_spill] sm:$0xff] %v2916_v31  ;;  %1726 = vperm.xlu0 %2342, %v2911_v42   ;;  %v1816_v31 = vld [vmem:[#allocation2 + $0x122] ss:$2 sm:$0xff] }
 0x122   : > { %v2921_v29 = vpop.permute.xlu0 %1828  ;;  %1128 = vperm.xlu1 %2329, %v2830_v37  }
 0x123   : > { %3894 = vst [vmem:[#allocation58_spill] sm:$0xff] %v2921_v29  ;;  %v2924_v50 = vpop.permute.xlu1 %754 }
 0x124   : > { %3895 = vst [vmem:[#allocation59_spill] sm:$0xff] %v2924_v50  ;;  %1882 = vperm.xlu0 %2342, %v2919_v12   ;;  %v1820_v50 = vld [vmem:[#allocation2 + $0x182] ss:$2 sm:$0xff] }
 0x126   : > { %v2927_v3 = vpop.permute.xlu0 %1843  ;;  %1138 = vperm.xlu1 %2329, %v2837_v27  }
 0x127   : > { %3896 = vst [vmem:[#allocation60_spill] sm:$0xff] %v2927_v3  ;;  %v2930_v40 = vpop.permute.xlu1 %759 }
 0x128   : > { %1894 = vperm.xlu0 %2342, %v1812_v57  }
 0x12a   : > { %v2932_v42 = vpop.permute.xlu0 %1853  ;;  %2330 = vset.pattern.permute.xlu1 %v3863_v8 }
 0x12b   : > { %3897 = vst [vmem:[#allocation61_spill] sm:$0xff] %v2932_v42  ;;  %v2935_v29 = vpop.permute.xlu1 %769  ;;  %1166 = vperm.xlu1 %2330, %v2673_v9  }
 0x12c   : > { %3898 = vst [vmem:[#allocation62_spill] sm:$0xff] %v2935_v29  ;;  %1902 = vperm.xlu0 %2342, %v1816_v31  }
 0x12f   : > { %v2938_v12 = vpop.permute.xlu0 %443  ;;  %v2940_v52 = vpop.permute.xlu1 %779  ;;  %1170 = vperm.xlu1 %2330, %v1090_v43  }
 0x130   : > { %3899 = vst [vmem:[#allocation63_spill] sm:$0xff] %v2940_v52  ;;  %1910 = vperm.xlu0 %2342, %v1820_v50  }
 0x133   : > { %v2942_v3 = vpop.permute.xlu0 %455  ;;  %1178 = vperm.xlu1 %2330, %v2678_v11  }
 0x134   : > { %2344 = vset.pattern.permute.xlu0 %v3874_v54  ;;  %v2946_v57 = vpop.permute.xlu1 %807 }
 0x135   : > { %3900 = vst [vmem:[#allocation64_spill] sm:$0xff] %v2946_v57  ;;  %499 = vperm.xlu0 %2344, %v2606_v49  }
 0x137   : > { %v2949_v42 = vpop.permute.xlu0 %463  ;;  %1186 = vperm.xlu1 %2330, %v2683_v14  }
 0x138   : > { %v2952_v31 = vpop.permute.xlu1 %811 }
 0x139   : > { %511 = vperm.xlu0 %2344, %v2613_v51  }
 0x13b   : > { %v2955_v52 = vpop.permute.xlu0 %471  ;;  %2331 = vset.pattern.permute.xlu1 %v3874_v54 }
 0x13c   : > { %v2958_v50 = vpop.permute.xlu1 %819  ;;  %1214 = vperm.xlu1 %2331, %v2814_v0  }
 0x13d   : > { %3901 = vst [vmem:[#allocation65_spill] sm:$0xff] %v2958_v50  ;;  %519 = vperm.xlu0 %2344, %v2619_v53  }
 0x13f   : > { %v2962_v57 = vpop.permute.xlu0 %627 }
 0x140   : > { %v2964_v49 = vpop.permute.xlu1 %827  ;;  %1222 = vperm.xlu1 %2331, %v1090_v43   ;;  %v1270_v43 = vld [vmem:[#allocation2 + $0x7a] ss:$2 sm:$0xff] }
 0x141   : > { %675 = vperm.xlu0 %2344, %v2625_v55  }
 0x143   : > { %v2967_v29 = vpop.permute.xlu0 %639 }
 0x144   : > { %1226 = vperm.xlu1 %2331, %v2821_v62  }
 0x145   : > { %687 = vperm.xlu0 %2344, %v2629_v56   ;;  %v2971_v51 = vpop.permute.xlu1 %855 }
 0x147   : > { %v2973_v50 = vpop.permute.xlu0 %647 }
 0x148   : > { %1234 = vperm.xlu1 %2331, %v2830_v37  }
 0x149   : > { %695 = vperm.xlu0 %2344, %v2634_v58   ;;  %v2977_v0 = vpop.permute.xlu1 %863 }
 0x14b   : > { %v2979_v53 = vpop.permute.xlu0 %803 }
 0x14c   : > { %3902 = vst [vmem:[#allocation66_spill] sm:$0xff] %v2979_v53  ;;  %1242 = vperm.xlu1 %2331, %v2837_v27   ;;  %v3987_v53 = vld [vmem:[#allocation29_spill] sm:$0xff] }
 0x14d   : > { %703 = vperm.xlu0 %2344, %v2637_v59   ;;  %v2983_v55 = vpop.permute.xlu1 %867 }
 0x14e   : > { %3903 = vst [vmem:[#allocation67_spill] sm:$0xff] %v2983_v55 }
 0x14f   : > { %v2985_v62 = vpop.permute.xlu0 %815 }
 0x150   : > { %2332 = vset.pattern.permute.xlu1 %v3884_v47 }
 0x151   : > { %859 = vperm.xlu0 %2344, %v2641_v60   ;;  %v2989_v56 = vpop.permute.xlu1 %875  ;;  %1288 = vperm.xlu1 %2332, %v2843_v10  }
 0x152   : > { %3904 = vst [vmem:[#allocation68_spill] sm:$0xff] %v2989_v56 }
 0x153   : > { %v2992_v58 = vpop.permute.xlu0 %823 }
 0x155   : > { %871 = vperm.xlu0 %2344, %v2645_v61   ;;  %v2995_v27 = vpop.permute.xlu1 %883  ;;  %1293 = vperm.xlu1 %2332, %v1270_v43  }
 0x156   : > { %3905 = vst [vmem:[#allocation69_spill] sm:$0xff] %v2995_v27  ;;  %v3958_v27 = vld [vmem:[#allocation10_spill] sm:$0xff] }
 0x157   : > { %v2997_v59 = vpop.permute.xlu0 %831 }
 0x158   : > { %3906 = vst [vmem:[#allocation70_spill] sm:$0xff] %v2997_v59 }
 0x159   : > { %879 = vperm.xlu0 %2344, %v2649_v63   ;;  %1303 = vperm.xlu1 %2332, %v2851_v2  }
 0x15a   : > { %v3001_v37 = vpop.permute.xlu1 %928 }
 0x15b   : > { %3907 = vst [vmem:[#allocation71_spill] sm:$0xff] %v3001_v37  ;;  %v3003_v60 = vpop.permute.xlu0 %986 }
 0x15c   : > { %3908 = vst [vmem:[#allocation72_spill] sm:$0xff] %v3003_v60 }
 0x15d   : > { %1034 = vperm.xlu0 %2344, %v2654_v4   ;;  %1313 = vperm.xlu1 %2332, %v2859_v34  }
 0x15e   : > { %v3007_v56 = vpop.permute.xlu1 %933 }
 0x15f   : > { %3909 = vst [vmem:[#allocation73_spill] sm:$0xff] %v3007_v56  ;;  %v3009_v61 = vpop.permute.xlu0 %998 }
 0x160   : > { %3910 = vst [vmem:[#allocation74_spill] sm:$0xff] %v3009_v61 }
 0x161   : > { %1046 = vperm.xlu0 %2344, %v2659_v5   ;;  %2333 = vset.pattern.permute.xlu1 %v3863_v8 }
 0x162   : > { %v3013_v59 = vpop.permute.xlu1 %943  ;;  %1342 = vperm.xlu1 %2333, %v2689_v16  }
 0x163   : > { %3911 = vst [vmem:[#allocation75_spill] sm:$0xff] %v3013_v59  ;;  %v3016_v63 = vpop.permute.xlu0 %1006  ;;  %v3956_v59 = vld [vmem:[#allocation9_spill] sm:$0xff] }
 0x164   : > { %3912 = vst [vmem:[#allocation76_spill] sm:$0xff] %v3016_v63 }
 0x165   : > { %1054 = vperm.xlu0 %2344, %v2663_v6  }
 0x166   : > { %v3019_v60 = vpop.permute.xlu1 %953  ;;  %1350 = vperm.xlu1 %2333, %v1270_v43  }
 0x167   : > { %3913 = vst [vmem:[#allocation77_spill] sm:$0xff] %v3019_v60  ;;  %v3021_v4 = vpop.permute.xlu0 %1162 }
 0x168   : > { %3914 = vst [vmem:[#allocation78_spill] sm:$0xff] %v3021_v4 }
 0x169   : > { %1062 = vperm.xlu0 %2344, %v2667_v7  }
 0x16a   : > { %1354 = vperm.xlu1 %2333, %v2693_v17  }
 0x16b   : > { %v3025_v5 = vpop.permute.xlu0 %1174  ;;  %v3027_v61 = vpop.permute.xlu1 %982 }
 0x16c   : > { %3915 = vst [vmem:[#allocation79_spill] sm:$0xff] %v3025_v5  ;;  %3916 = vst [vmem:[#allocation80_spill] sm:$0xff] %v3027_v61  ;;  %v3953_v61 = vld [vmem:[#allocation14_spill] sm:$0xff] }
 0x16d   : > { %1218 = vperm.xlu0 %2344, %v2673_v9  }
 0x16e   : > { %1362 = vperm.xlu1 %2333, %v2698_v18  }
 0x16f   : > { %v3031_v63 = vpop.permute.xlu0 %1182  ;;  %v3033_v6 = vpop.permute.xlu1 %990 }
 0x170   : > { %3917 = vst [vmem:[#allocation81_spill] sm:$0xff] %v3031_v63  ;;  %3918 = vst [vmem:[#allocation82_spill] sm:$0xff] %v3033_v6 }
 0x171   : > { %1230 = vperm.xlu0 %2344, %v2678_v11  }
 0x172   : > { %1370 = vperm.xlu1 %2333, %v2701_v19  }
 0x173   : > { %v3037_v4 = vpop.permute.xlu0 %1190  ;;  %v3039_v7 = vpop.permute.xlu1 %994 }
 0x174   : > { %3919 = vst [vmem:[#allocation83_spill] sm:$0xff] %v3037_v4  ;;  %3920 = vst [vmem:[#allocation84_spill] sm:$0xff] %v3039_v7 }
 0x175   : > { %1238 = vperm.xlu0 %2344, %v2683_v14  }
 0x176   : > { %2334 = vset.pattern.permute.xlu1 %v3874_v54 }
 0x177   : > { %v3043_v5 = vpop.permute.xlu0 %1346  ;;  %1398 = vperm.xlu1 %2334, %v2843_v10   ;;  %v3046_v9 = vpop.permute.xlu1 %1002 }
 0x178   : > { %3921 = vst [vmem:[#allocation85_spill] sm:$0xff] %v3043_v5  ;;  %3922 = vst [vmem:[#allocation86_spill] sm:$0xff] %v3046_v9 }
 0x179   : > { %1394 = vperm.xlu0 %2344, %v2689_v16  }
 0x17b   : > { %v3049_v63 = vpop.permute.xlu0 %1358  ;;  %1402 = vperm.xlu1 %2334, %v1270_v43   ;;  %v3051_v11 = vpop.permute.xlu1 %1010 }
 0x17c   : > { %3923 = vst [vmem:[#allocation87_spill] sm:$0xff] %v3049_v63  ;;  %3924 = vst [vmem:[#allocation88_spill] sm:$0xff] %v3051_v11 }
 0x17d   : > { %1406 = vperm.xlu0 %2344, %v2693_v17  }
 0x17f   : > { %v3054_v4 = vpop.permute.xlu0 %1366  ;;  %1410 = vperm.xlu1 %2334, %v2851_v2   ;;  %v3073_v2 = vld [vmem:[#allocation2 + $0x90] ss:$2 sm:$0xff] }
 0x180   : > { %3925 = vst [vmem:[#allocation89_spill] sm:$0xff] %v3054_v4  ;;  %v3057_v14 = vpop.permute.xlu1 %1038 }
 0x181   : > { %3926 = vst [vmem:[#allocation90_spill] sm:$0xff] %v3057_v14  ;;  %1414 = vperm.xlu0 %2344, %v2698_v18  }
 0x183   : > { %v3060_v10 = vpop.permute.xlu0 %1522  ;;  %1418 = vperm.xlu1 %2334, %v2859_v34  }
 0x184   : > { %3927 = vst [vmem:[#allocation91_spill] sm:$0xff] %v3060_v10  ;;  %v3063_v16 = vpop.permute.xlu1 %1042 }
 0x185   : > { %3928 = vst [vmem:[#allocation92_spill] sm:$0xff] %v3063_v16  ;;  %1422 = vperm.xlu0 %2344, %v2701_v19  }
 0x187   : > { %v3066_v43 = vpop.permute.xlu0 %1534  ;;  %2335 = vset.pattern.permute.xlu1 %v3884_v47 }
 0x188   : > { %3929 = vst [vmem:[#allocation93_spill] sm:$0xff] %v3066_v43  ;;  %1463 = vperm.xlu1 %2335, %v2867_v45   ;;  %v3070_v17 = vpop.permute.xlu1 %1050 }
 0x189   : > { %3930 = vst [vmem:[#allocation94_spill] sm:$0xff] %v3070_v17  ;;  %1578 = vperm.xlu0 %2344, %v2705_v20  }
 0x18b   : > { %v3075_v18 = vpop.permute.xlu0 %1542 }
 0x18c   : > { %3931 = vst [vmem:[#allocation95_spill] sm:$0xff] %v3075_v18  ;;  %1473 = vperm.xlu1 %2335, %v3073_v2   ;;  %v3078_v34 = vpop.permute.xlu1 %1058 }
 0x18d   : > { %3932 = vst [vmem:[#allocation96_spill] sm:$0xff] %v3078_v34  ;;  %1590 = vperm.xlu0 %2344, %v2709_v21  }
 0x18f   : > { %v3081_v19 = vpop.permute.xlu0 %1550 }
 0x190   : > { %3933 = vst [vmem:[#allocation97_spill] sm:$0xff] %v3081_v19  ;;  %1478 = vperm.xlu1 %2335, %v2874_v15  }
 0x191   : > { %1598 = vperm.xlu0 %2344, %v2713_v22   ;;  %v3085_v43 = vpop.permute.xlu1 %1103 }
 0x192   : > { %3934 = vst [vmem:[#allocation98_spill] sm:$0xff] %v3085_v43 }
 0x193   : > { %v3087_v10 = vpop.permute.xlu0 %1706 }
 0x194   : > { %3935 = vst [vmem:[#allocation99_spill] sm:$0xff] %v3087_v10  ;;  %1488 = vperm.xlu1 %2335, %v2881_v1  }
 0x195   : > { %1754 = vperm.xlu0 %2344, %v2718_v23   ;;  %v3091_v18 = vpop.permute.xlu1 %1113 }
 0x196   : > { %3936 = vst [vmem:[#allocation100_spill] sm:$0xff] %v3091_v18  ;;  %v422_v18 = vlaneseq }
 0x197   : > { %v3093_v4 = vpop.permute.xlu0 %1718 }
 0x198   : > { %3937 = vst [vmem:[#allocation101_spill] sm:$0xff] %v3093_v4  ;;  %1498 = vperm.xlu1 %2335, %v2888_v13  }
 0x199   : > { %1766 = vperm.xlu0 %2344, %v2721_v24   ;;  %v3097_v19 = vpop.permute.xlu1 %1118 }
 0x19a   : > { %3938 = vst [vmem:[#allocation102_spill] sm:$0xff] %v3097_v19 }
 0x19b   : > { %v3099_v63 = vpop.permute.xlu0 %1726 }
 0x19c   : > { %3939 = vst [vmem:[#allocation103_spill] sm:$0xff] %v3099_v63  ;;  %2336 = vset.pattern.permute.xlu1 %v3863_v8  ;;  %v423_v63 = vshrl.u32 %v422_v18, 7  ;;  %v354_v18 = vld [vmem:[%s3808_s1 + $0xa] sm:$0x3]  ;;  %v3960_v8 = vld [vmem:[#allocation12_spill] sm:$0xff] }
 0x19d   : > { %1774 = vperm.xlu0 %2344, %v2725_v25   ;;  %1526 = vperm.xlu1 %2336, %v2705_v20   ;;  %v3104_v10 = vpop.permute.xlu1 %1128  ;;  %v3155_v19 = vunpack.c.l.bf16 %v354_v18 }
 0x19e   : > { %3940 = vst [vmem:[#allocation104_spill] sm:$0xff] %v3104_v10  ;;  %v3146_v10 = vsub.s32 0, %v423_v63  ;;  %v3148_v17 = vsub.s32 2, %v423_v63 }
 0x19f   : > { %v3106_v43 = vpop.permute.xlu0 %1882 }
 0x1a0   : > { %3941 = vst [vmem:[#allocation105_spill] sm:$0xff] %v3106_v43  ;;  %v3127_v43 = vsub.s32 1, %v423_v63  ;;  %3949 = vst [vmem:[#allocation113_spill] sm:$0xff] %v3146_v10  ;;  %v3184_v18 = vrot.slane %v3155_v19, %v3146_v10 }
 0x1a1   : > { %1782 = vperm.xlu0 %2344, %v2729_v26   ;;  %1530 = vperm.xlu1 %2336, %v3073_v2   ;;  %v3110_v4 = vpop.permute.xlu1 %1138  ;;  %v349_v26 = vld [vmem:[%s3808_s1] sm:$0x3] }
 0x1a2   : > { %3942 = vst [vmem:[#allocation106_spill] sm:$0xff] %v3110_v4  ;;  %3946 = vst [vmem:[#allocation110_spill] sm:$0xff] %v3127_v43  ;;  %v358_v4 = vunpack.c.l.bf16 %v349_v26 }
 0x1a3   : > { %v3112_v24 = vpop.permute.xlu0 %1894 }
 0x1a4   : > { %3943 = vst [vmem:[#allocation107_spill] sm:$0xff] %v3112_v24  ;;  %v350_v24 = vld [vmem:[%s3808_s1 + $0x2] sm:$0x3]  ;;  %v425_v63 = vrot.slane %v358_v4, %v3146_v10 }
 0x1a5   : > { %1938 = vperm.xlu0 %2344, %v2733_v28   ;;  %1538 = vperm.xlu1 %2336, %v2709_v21   ;;  %v351_v21 = vld [vmem:[%s3808_s1 + $0x4] sm:$0x3]  ;;  %v352_v28 = vld [vmem:[%s3808_s1 + $0x6] sm:$0x3] }
 0x1a6   : > { %v3116_v25 = vpop.permute.xlu1 %1166  ;;  %v360_v34 = vunpack.c.l.bf16 %v351_v21  ;;  %v3151_v11 = vunpack.c.l.bf16 %v352_v28  ;;  %v3172_v28 = vrot.slane %v358_v4, %v3148_v17  ;;  %v430_v9 = vmul.f32 %v425_v63, %v2752_v39  ;;  %v3955_v39 = vld [vmem:[#allocation8_spill] sm:$0xff] }
 0x1a7   : > { %3944 = vst [vmem:[#allocation108_spill] sm:$0xff] %v3116_v25  ;;  %v3118_v20 = vpop.permute.xlu0 %1902  ;;  %v433_v60 = vmul.f32 %v425_v63, %v3955_v39 }
 0x1a8   : > { %3945 = vst [vmem:[#allocation109_spill] sm:$0xff] %v3118_v20  ;;  %v3169_v21 = vrot.slane %v360_v34, %v3146_v10  ;;  %v3227_v23 = vrot.slane %v360_v34, %v3148_v17 }
 0x1a9   : > { %1950 = vperm.xlu0 %2344, %v2736_v30   ;;  %1546 = vperm.xlu1 %2336, %v2713_v22   ;;  %v353_v30 = vld [vmem:[%s3808_s1 + $0x8] sm:$0x3]  ;;  %v359_v22 = vunpack.c.l.bf16 %v350_v24 }
 0x1aa   : > { %v3142_v20 = vpop.permute.xlu1 %1170  ;;  %v3153_v5 = vunpack.c.l.bf16 %v353_v30  ;;  %v3176_v30 = vrot.slane %v3151_v11, %v3146_v10 }
 0x1ab   : > { %3947 = vst [vmem:[#allocation111_spill] sm:$0xff] %v3142_v20  ;;  %v3144_v25 = vpop.permute.xlu0 %1910  ;;  %v3159_v20 = vrot.slane %v358_v4, %v3127_v43  ;;  %v427_v4 = vmul.f32 %v425_v63, %v2746_v36  ;;  %v3196_v14 = vrot.slane %v359_v22, %v3148_v17 }
 0x1ac   : > { %3948 = vst [vmem:[#allocation112_spill] sm:$0xff] %v3144_v25  ;;  %3951 = vst [vmem:[#allocation115_spill] sm:$0xff] %v3176_v30  ;;  %v3187_v25 = vrot.slane %v359_v22, %v3127_v43 }
 0x1ad   : > { %1958 = vperm.xlu0 %2344, %v2741_v33   ;;  %2337 = vset.pattern.permute.xlu1 %v3874_v54  ;;  %v3166_v33 = vrot.slane %v359_v22, %v3146_v10  ;;  %v3190_v54 = vmul.f32 %v425_v63, %v2739_v32  ;;  %v480_v32 = vmul.f32 %v3159_v20, %v2776_v46 }
 0x1ae   : > { %1574 = vperm.xlu1 %2337, %v2867_v45   ;;  %v3162_v26 = vpop.permute.xlu1 %1178  ;;  %v3180_v45 = vrot.slane %v3153_v5, %v3146_v10  ;;  %v428_v10 = vmul.f32 %v425_v63, %v2744_v35  ;;  %v482_v36 = vmul.f32 %v3159_v20, %v2782_v48  ;;  %v432_v22 = vmul.f32 %v425_v63, %v2759_v41  ;;  %v3954_v35 = vld [vmem:[#allocation7_spill] sm:$0xff]  ;;  %v3957_v48 = vld [vmem:[#allocation18_spill] sm:$0xff] }
 0x1af   : > { %3950 = vst [vmem:[#allocation114_spill] sm:$0xff] %v3162_v26  ;;  %v479_v26 = vmul.f32 %v3159_v20, %v2770_v44  ;;  %v429_v44 = vmul.f32 %v425_v63, %v2750_v38  ;;  %v431_v6 = vmul.f32 %v425_v63, %v3954_v35  ;;  %v3218_v46 = vmul.f32 %v3166_v33, %v3956_v59  ;;  %v3959_v35 = vld [vmem:[#allocation11_spill] sm:$0xff] }
 0x1b0   : > { %v500_v24 = vpop.permute.xlu0 %499  ;;  %v532_v37 = vmul.f32 %v3172_v28, %v3957_v48  ;;  %v609_v41 = vmul.f32 %v3166_v33, %v3958_v27  ;;  %v488_v63 = vadd.f32 %v480_v32, %v428_v10  ;;  %v3232_v59 = vmul.f32 %v3166_v33, %v3959_v35  ;;  %v3965_v32 = vld [vmem:[#allocation16_spill] sm:$0xff] }
 0x1b1   : > { %v487_v38 = vadd.f32 %v479_v26, %v427_v4  ;;  %v490_v39 = vadd.f32 %v482_v36, %v430_v9  ;;  %v3236_v26 = vmul.f32 %v3166_v33, %v3960_v8  ;;  %v3252_v9 = vmul.f32 %v3172_v28, %v3965_v32  ;;  %v3966_v36 = vld [vmem:[#allocation17_spill] sm:$0xff] }
 0x1b2   : > { %1582 = vperm.xlu1 %2337, %v3073_v2   ;;  %v3199_v16 = vpop.permute.xlu1 %1186  ;;  %v484_v2 = vmul.f32 %v3159_v20, %v3953_v61  ;;  %v481_v61 = vmul.f32 %v3159_v20, %v2942_v3  ;;  %v3962_v3 = vld [vmem:[#allocation13_spill] sm:$0xff]  ;;  %v3256_v8 = vmul.f32 %v3169_v21, %v3966_v36  ;;  %v540_v35 = vadd.f32 %v532_v37, %v488_v63 }
 0x1b3   : > { %3952 = vst [vmem:[#allocation116_spill] sm:$0xff] %v3199_v16  ;;  %v3212_v16 = vrot.slane %v360_v34, %v3127_v43  ;;  %v3244_v34 = vmul.f32 %v3169_v21, %v3962_v3  ;;  %v3970_v3 = vld [vmem:[#allocation20_spill] sm:$0xff]  ;;  %v3268_v32 = vrot.slane %v3151_v11, %v3127_v43  ;;  %v531_v55 = vmul.f32 %v3172_v28, %v500_v24  ;;  %v3972_v37 = vld [vmem:[#allocation21_spill] sm:$0xff] }
 0x1b4   : > { %v512_v7 = vpop.permute.xlu0 %511  ;;  %v3240_v48 = vadd.f32 %v484_v2, %v432_v22  ;;  %3967 = vst [vmem:[#allocation8_spill] sm:$0xff] %v3256_v8  ;;  %v483_v2 = vmul.f32 %v3159_v20, %v2949_v42  ;;  %v489_v56 = vadd.f32 %v481_v61, %v429_v44  ;;  %v3274_v63 = vmul.f32 %v3176_v30, %v3972_v37  ;;  %v3975_v42 = vld [vmem:[#allocation23_spill] sm:$0xff]  ;;  %v3977_v44 = vld [vmem:[#allocation28_spill] sm:$0xff]  ;;  %v3981_v8 = vld [vmem:[#allocation25_spill] sm:$0xff] }
 0x1b5   : > { %3971 = vst [vmem:[#allocation18_spill] sm:$0xff] %v3268_v32  ;;  %v608_v61 = vmul.f32 %v3166_v33, %v3977_v44  ;;  %v3980_v24 = vld [vmem:[#allocation24_spill] sm:$0xff]  ;;  %v3292_v37 = vmul.f32 %v3176_v30, %v3981_v8  ;;  %v3309_v8 = vmul.f32 %v3180_v45, %v3987_v53 }
 0x1b6   : > { %1586 = vperm.xlu1 %2337, %v2874_v15   ;;  %v3963_v15 = vld [vmem:[#allocation15_spill] sm:$0xff]  ;;  %3973 = vst [vmem:[#allocation10_spill] sm:$0xff] %v3274_v63  ;;  %v3983_v63 = vld [vmem:[#allocation26_spill] sm:$0xff] }
 0x1b7   : > { %v3238_v4 = vpop.permute.xlu1 %1214  ;;  %v3248_v10 = vmul.f32 %v3169_v21, %v3963_v15  ;;  %v533_v15 = vmul.f32 %v3172_v28, %v3970_v3  ;;  %3982 = vst [vmem:[#allocation15_spill] sm:$0xff] %v3292_v37 }
 0x1b8   : > { %3961 = vst [vmem:[#allocation14_spill] sm:$0xff] %v3238_v4  ;;  %v520_v27 = vpop.permute.xlu0 %519  ;;  %v3968_v4 = vld [vmem:[#allocation19_spill] sm:$0xff] }
 0x1b9   : > { %3964 = vst [vmem:[#allocation7_spill] sm:$0xff] %v3248_v10  ;;  %v3260_v22 = vmul.f32 %v3176_v30, %v3968_v4  ;;  %v3974_v4 = vld [vmem:[#allocation22_spill] sm:$0xff]  ;;  %3988 = vst [vmem:[#allocation19_spill] sm:$0xff] %v3309_v8  ;;  %v541_v37 = vadd.f32 %v533_v15, %v489_v56  ;;  %v3990_v10 = vld [vmem:[#allocation31_spill] sm:$0xff] }
 0x1ba   : > { %1594 = vperm.xlu1 %2337, %v2881_v1   ;;  %v535_v36 = vmul.f32 %v3172_v28, %v3974_v4  ;;  %v537_v1 = vmul.f32 %v3172_v28, %v3980_v24  ;;  %v607_v4 = vmul.f32 %v3166_v33, %v3983_v63  ;;  %v534_v24 = vmul.f32 %v3172_v28, %v512_v7 }
 0x1bb   : > { %3969 = vst [vmem:[#allocation9_spill] sm:$0xff] %v3260_v22  ;;  %v3280_v22 = vmul.f32 %v3176_v30, %v3975_v42  ;;  %v3284_v3 = vpop.permute.xlu1 %1222  ;;  %v3298_v42 = vrot.slane %v3153_v5, %v3127_v43  ;;  %v485_v63 = vmul.f32 %v3159_v20, %v2955_v52  ;;  %v539_v30 = vadd.f32 %v531_v55, %v487_v38  ;;  %v3994_v55 = vld [vmem:[#allocation34_spill] sm:$0xff] }
 0x1bc   : > { %3978 = vst [vmem:[#allocation12_spill] sm:$0xff] %v3284_v3  ;;  %v3286_v32 = vpop.permute.xlu0 %675  ;;  %v478_v3 = vmul.f32 %v3159_v20, %v2938_v12  ;;  %v3318_v12 = vmul.f32 %v3180_v45, %v3990_v10  ;;  %v3995_v20 = vld [vmem:[#allocation35_spill] sm:$0xff]  ;;  %v3336_v10 = vrot.slane %v3155_v19, %v3127_v43  ;;  %v3998_v43 = vld [vmem:[#allocation38_spill] sm:$0xff] }
 0x1bd   : > { %3976 = vst [vmem:[#allocation11_spill] sm:$0xff] %v3280_v22  ;;  %3979 = vst [vmem:[#allocation13_spill] sm:$0xff] %v3286_v32  ;;  %v3985_v22 = vld [vmem:[#allocation27_spill] sm:$0xff]  ;;  %v491_v32 = vadd.f32 %v483_v2, %v431_v6  ;;  %v3992_v6 = vld [vmem:[#allocation36_spill] sm:$0xff]  ;;  %v3332_v38 = vmul.f32 %v3184_v18, %v3995_v20 }
 0x1be   : > { %3984 = vst [vmem:[#allocation16_spill] sm:$0xff] %v3298_v42  ;;  %v3302_v44 = vmul.f32 %v3180_v45, %v3985_v22  ;;  %1602 = vperm.xlu1 %2337, %v2888_v13   ;;  %v616_v42 = vadd.f32 %v608_v61, %v540_v35  ;;  %v3989_v22 = vld [vmem:[#allocation30_spill] sm:$0xff]  ;;  %3991 = vst [vmem:[#allocation20_spill] sm:$0xff] %v3318_v12  ;;  %v660_v7 = vmul.f32 %v3187_v25, %v3992_v6  ;;  %v3993_v2 = vld [vmem:[#allocation32_spill] sm:$0xff] }
 0x1bf   : > { %v3322_v53 = vpop.permute.xlu1 %1226  ;;  %v612_v52 = vmul.f32 %v3166_v33, %v3993_v2  ;;  %v3328_v13 = vmul.f32 %v3187_v25, %v3994_v55  ;;  %v486_v35 = vadd.f32 %v478_v3, %v3190_v54  ;;  %v543_v15 = vadd.f32 %v535_v36, %v491_v32  ;;  %v3996_v12 = vld [vmem:[#allocation37_spill] sm:$0xff]  ;;  %v4003_v36 = vld [vmem:[#allocation47_spill] sm:$0xff] }
 0x1c0   : > { %3986 = vst [vmem:[#allocation17_spill] sm:$0xff] %v3302_v44  ;;  %v610_v44 = vmul.f32 %v3166_v33, %v3989_v22  ;;  %v688_v56 = vpop.permute.xlu0 %687  ;;  %v542_v61 = vadd.f32 %v534_v24, %v490_v39  ;;  %v536_v22 = vmul.f32 %v3172_v28, %v520_v27  ;;  %v493_v6 = vadd.f32 %v485_v63, %v433_v60  ;;  %v3999_v60 = vld [vmem:[#allocation48_spill] sm:$0xff] }
 0x1c1   : > { %v659_v33 = vmul.f32 %v3187_v25, %v2962_v57  ;;  %v615_v2 = vadd.f32 %v607_v4, %v539_v30  ;;  %v617_v55 = vadd.f32 %v609_v41, %v541_v37  ;;  %v668_v20 = vadd.f32 %v660_v7, %v616_v42  ;;  %v4000_v30 = vld [vmem:[#allocation39_spill] sm:$0xff]  ;;  %v4002_v27 = vld [vmem:[#allocation40_spill] sm:$0xff] }
 0x1c2   : > { %2338 = vset.pattern.permute.xlu1 %v3884_v47  ;;  %v3345_v8 = vmul.f32 %v3184_v18, %v3996_v12  ;;  %v661_v54 = vmul.f32 %v3187_v25, %v3998_v43  ;;  %v3351_v39 = vrot.slane %v3151_v11, %v3148_v17  ;;  %v3358_v41 = vmul.f32 %v3184_v18, %v4000_v30  ;;  %v3365_v37 = vld [vmem:[#allocation2 + $0x91] ss:$2 sm:$0xff]  ;;  %v4005_v47 = vld [vmem:[#allocation45_spill] sm:$0xff] }
 0x1c3   : > { %1648 = vperm.xlu1 %2338, %v3999_v60   ;;  %v3354_v28 = vpop.permute.xlu1 %1234  ;;  %v663_v32 = vmul.f32 %v3187_v25, %v4002_v27  ;;  %v712_v3 = vmul.f32 %v3196_v14, %v4003_v36  ;;  %v713_v43 = vmul.f32 %v3196_v14, %v688_v56  ;;  %v4004_v11 = vld [vmem:[#allocation42_spill] sm:$0xff]  ;;  %v618_v42 = vadd.f32 %v610_v44, %v542_v61 }
 0x1c4   : > { %3997 = vst [vmem:[#allocation21_spill] sm:$0xff] %v3345_v8  ;;  %v696_v57 = vpop.permute.xlu0 %695  ;;  %4001 = vst [vmem:[#allocation22_spill] sm:$0xff] %v3358_v41  ;;  %v665_v4 = vmul.f32 %v3187_v25, %v4004_v11  ;;  %v544_v24 = vadd.f32 %v536_v22, %v3240_v48  ;;  %v619_v63 = vadd.f32 %v3232_v59, %v543_v15  ;;  %v4006_v41 = vld [vmem:[#allocation59_spill] sm:$0xff]  ;;  %v4008_v15 = vld [vmem:[#allocation53_spill] sm:$0xff] }
 0x1c5   : > { %v538_v12 = vadd.f32 %v3252_v9, %v486_v35  ;;  %v545_v7 = vadd.f32 %v537_v1, %v493_v6  ;;  %v667_v30 = vadd.f32 %v659_v33, %v615_v2  ;;  %v669_v27 = vadd.f32 %v661_v54, %v617_v55  ;;  %v4007_v1 = vld [vmem:[#allocation50_spill] sm:$0xff]  ;;  %v4009_v22 = vld [vmem:[#allocation56_spill] sm:$0xff] }
 0x1c6   : > { %v711_v36 = vmul.f32 %v3196_v14, %v4005_v47  ;;  %v788_v56 = vmul.f32 %v3169_v21, %v4006_v41  ;;  %v662_v8 = vmul.f32 %v3187_v25, %v2967_v29  ;;  %v715_v44 = vmul.f32 %v3196_v14, %v696_v57 }
 0x1c7   : > { %1653 = vperm.xlu1 %2338, %v3365_v37   ;;  %v3380_v48 = vpop.permute.xlu1 %1242  ;;  %v720_v9 = vadd.f32 %v712_v3, %v668_v20  ;;  %v714_v35 = vmul.f32 %v3196_v14, %v4007_v1  ;;  %v716_v47 = vmul.f32 %v3196_v14, %v4008_v15  ;;  %v721_v61 = vadd.f32 %v713_v43, %v669_v27  ;;  %v4010_v27 = vld [vmem:[#allocation51_spill] sm:$0xff] }
 0x1c8   : > { %v704_v59 = vpop.permute.xlu0 %703  ;;  %v3388_v6 = vmul.f32 %v3169_v21, %v4009_v22  ;;  %v670_v29 = vadd.f32 %v662_v8, %v618_v42  ;;  %v620_v33 = vadd.f32 %v612_v52, %v544_v24  ;;  %v671_v2 = vadd.f32 %v663_v32, %v619_v63  ;;  %v4011_v52 = vld [vmem:[#allocation62_spill] sm:$0xff]  ;;  %v4013_v63 = vld [vmem:[#allocation64_spill] sm:$0xff]  ;;  %v4016_v22 = vld [vmem:[#allocation7_spill] sm:$0xff] }
 0x1c9   : > { %v789_v55 = vmul.f32 %v3169_v21, %v2930_v40  ;;  %v614_v54 = vadd.f32 %v3218_v46, %v538_v12  ;;  %v621_v20 = vadd.f32 %v3236_v26, %v545_v7  ;;  %v719_v57 = vadd.f32 %v711_v36, %v667_v30  ;;  %v4012_v40 = vld [vmem:[#allocation63_spill] sm:$0xff] }
 0x1ca   : > { %v796_v41 = vadd.f32 %v788_v56, %v720_v9  ;;  %v840_v3 = vmul.f32 %v3212_v16, %v2952_v31  ;;  %v664_v43 = vmul.f32 %v3187_v25, %v2973_v50  ;;  %v723_v11 = vadd.f32 %v715_v44, %v671_v2  ;;  %v4014_v44 = vld [vmem:[#allocation65_spill] sm:$0xff]  ;;  %v4017_v2 = vld [vmem:[#allocation66_spill] sm:$0xff] }
 0x1cb   : > { %1663 = vperm.xlu1 %2338, %v4010_v27   ;;  %v791_v32 = vmul.f32 %v3169_v21, %v4011_v52  ;;  %v793_v46 = vmul.f32 %v3169_v21, %v4012_v40  ;;  %v797_v42 = vadd.f32 %v789_v55, %v721_v61  ;;  %v717_v26 = vmul.f32 %v3196_v14, %v704_v59 }
 0x1cc   : > { %v860_v8 = vpop.permute.xlu0 %859  ;;  %v3404_v24 = vpop.permute.xlu1 %1288  ;;  %v839_v31 = vmul.f32 %v3212_v16, %v4013_v63  ;;  %v3410_v50 = vrot.slane %v3153_v5, %v3148_v17  ;;  %v672_v25 = vadd.f32 %v664_v43, %v620_v33  ;;  %v722_v12 = vadd.f32 %v714_v35, %v670_v29  ;;  %v4015_v5 = vld [vmem:[#allocation54_spill] sm:$0xff] }
 0x1cd   : > { %v841_v7 = vmul.f32 %v3212_v16, %v2985_v62  ;;  %v666_v30 = vadd.f32 %v3328_v13, %v614_v54  ;;  %v673_v21 = vadd.f32 %v665_v4, %v621_v20  ;;  %v795_v36 = vadd.f32 %v3244_v34, %v719_v57  ;;  %v4019_v20 = vld [vmem:[#allocation73_spill] sm:$0xff]  ;;  %v4020_v57 = vld [vmem:[#allocation115_spill] sm:$0xff]  ;;  %v4024_v63 = vld [vmem:[#allocation6_spill] sm:$0xff] }
 0x1ce   : > { %v848_v56 = vadd.f32 %v840_v3, %v796_v41  ;;  %v842_v59 = vmul.f32 %v3212_v16, %v4014_v44  ;;  %v892_v9 = vmul.f32 %v3227_v23, %v2977_v0  ;;  %v799_v1 = vadd.f32 %v791_v32, %v723_v11  ;;  %v4023_v32 = vld [vmem:[#allocation68_spill] sm:$0xff] }
 0x1cf   : > { %1673 = vperm.xlu1 %2338, %v4015_v5   ;;  %v844_v35 = vmul.f32 %v3212_v16, %v2964_v49  ;;  %v849_v62 = vadd.f32 %v841_v7, %v797_v42  ;;  %v725_v61 = vadd.f32 %v717_v26, %v673_v21  ;;  %v891_v13 = vmul.f32 %v3227_v23, %v860_v8  ;;  %v4018_v49 = vld [vmem:[#allocation67_spill] sm:$0xff] }
 0x1d0   : > { %v872_v15 = vpop.permute.xlu0 %871  ;;  %v3424_v4 = vpop.permute.xlu1 %1293  ;;  %v3428_v34 = vmul.f32 %v3227_v23, %v2971_v51  ;;  %v843_v0 = vmul.f32 %v3212_v16, %v2992_v58  ;;  %v798_v29 = vadd.f32 %v4016_v22, %v722_v12  ;;  %v724_v33 = vadd.f32 %v716_v47, %v672_v25  ;;  %v4021_v51 = vld [vmem:[#allocation13_spill] sm:$0xff] }
 0x1d1   : > { %v3435_v55 = vmul.f32 %v3212_v16, %v4017_v2  ;;  %v893_v54 = vmul.f32 %v3227_v23, %v4018_v49  ;;  %v967_v41 = vmul.f32 %v4020_v57, %v4019_v20  ;;  %v847_v3 = vadd.f32 %v839_v31, %v795_v36  ;;  %v4025_v12 = vld [vmem:[#allocation69_spill] sm:$0xff] }
 0x1d2   : > { %v900_v43 = vadd.f32 %v892_v9, %v848_v56  ;;  %v710_v11 = vmul.f32 %v3196_v14, %v4021_v51  ;;  %v851_v8 = vadd.f32 %v843_v0, %v799_v1  ;;  %v894_v58 = vmul.f32 %v3227_v23, %v872_v15  ;;  %v4026_v14 = vld [vmem:[#allocation70_spill] sm:$0xff]  ;;  %v4027_v56 = vld [vmem:[#allocation8_spill] sm:$0xff]  ;;  %v4028_v9 = vld [vmem:[#allocation71_spill] sm:$0xff] }
 0x1d3   : > { %v4022_v52 = vmov 1   ;;  %v895_v40 = vmul.f32 %v3227_v23, %v4023_v32  ;;  %v801_v42 = vadd.f32 %v793_v46, %v725_v61  ;;  %v899_v26 = vadd.f32 %v891_v13, %v847_v3  ;;  %v4029_v15 = vld [vmem:[#allocation72_spill] sm:$0xff]  ;;  %v4030_v46 = vld [vmem:[#allocation18_spill] sm:$0xff] }
 0x1d4   : > { %2339 = vset.pattern.permute.xlu1 %v4022_v52  ;;  %v880_v47 = vpop.permute.xlu0 %879  ;;  %v3448_v25 = vpop.permute.xlu1 %1303  ;;  %v901_v31 = vadd.f32 %v893_v54, %v849_v62  ;;  %v897_v7 = vmul.f32 %v3227_v23, %v4025_v12  ;;  %v845_v21 = vmul.f32 %v3212_v16, %v4026_v14  ;;  %v850_v36 = vadd.f32 %v842_v59, %v798_v29  ;;  %v4031_v0 = vld [vmem:[#allocation74_spill] sm:$0xff]  ;;  %v4032_v59 = vld [vmem:[#allocation75_spill] sm:$0xff]  ;;  %v4034_v51 = vld [vmem:[#allocation76_spill] sm:$0xff] }
 0x1d5   : > { %1702 = vperm.xlu1 %2339, %v4024_v63   ;;  %v800_v44 = vadd.f32 %v4027_v56, %v724_v33  ;;  %v966_v1 = vmul.f32 %v4020_v57, %v4028_v9  ;;  %v1018_v61 = vmul.f32 %v4030_v46, %v4029_v15  ;;  %v975_v13 = vadd.f32 %v967_v41, %v900_v43  ;;  %v4033_v41 = vld [vmem:[#allocation10_spill] sm:$0xff]  ;;  %v4037_v32 = vld [vmem:[#allocation80_spill] sm:$0xff]  ;;  %v4040_v12 = vld [vmem:[#allocation81_spill] sm:$0xff] }
 0x1d6   : > { %v1021_v22 = vmul.f32 %v4030_v46, %v4031_v0  ;;  %v718_v62 = vadd.f32 %v710_v11, %v666_v30  ;;  %v902_v2 = vadd.f32 %v894_v58, %v850_v36  ;;  %v896_v49 = vmul.f32 %v3227_v23, %v880_v47  ;;  %v4035_v11 = vld [vmem:[#allocation77_spill] sm:$0xff]  ;;  %v4036_v58 = vld [vmem:[#allocation82_spill] sm:$0xff]  ;;  %v4041_v14 = vld [vmem:[#allocation84_spill] sm:$0xff] }
 0x1d7   : > { %v903_v16 = vadd.f32 %v895_v40, %v851_v8  ;;  %v969_v29 = vmul.f32 %v4020_v57, %v4032_v59  ;;  %v853_v33 = vadd.f32 %v845_v21, %v801_v42  ;;  %v974_v20 = vadd.f32 %v966_v1, %v899_v26  ;;  %v4038_v42 = vld [vmem:[#allocation79_spill] sm:$0xff]  ;;  %v4039_v26 = vld [vmem:[#allocation16_spill] sm:$0xff] }
 0x1d8   : > { %v3462_v54 = vpop.permute.xlu0 %1034  ;;  %v3467_v3 = vpop.permute.xlu1 %1313  ;;  %v976_v43 = vadd.f32 %v4033_v41, %v901_v31  ;;  %v1023_v30 = vmul.f32 %v4030_v46, %v4034_v51  ;;  %v971_v23 = vmul.f32 %v4020_v57, %v4035_v11  ;;  %v1019_v8 = vmul.f32 %v4030_v46, %v4036_v58  ;;  %v4042_v1 = vld [vmem:[#allocation11_spill] sm:$0xff]  ;;  %v2346_v59 = vld [vmem:[#allocation2 + $0xc1] ss:$2 sm:$0xff]  ;;  %v4043_v11 = vld [vmem:[#allocation86_spill] sm:$0xff] }
 0x1d9   : > { %1710 = vperm.xlu1 %2339, %v3365_v37   ;;  %v852_v47 = vadd.f32 %v844_v35, %v800_v44  ;;  %v3478_v40 = vmul.f32 %v4030_v46, %v4037_v32  ;;  %v1200_v63 = vmul.f32 %v4039_v26, %v4038_v42  ;;  %v1202_v31 = vmul.f32 %v4039_v26, %v4040_v12  ;;  %v4044_v32 = vld [vmem:[#allocation92_spill] sm:$0xff] }
 0x1da   : > { %v1020_v21 = vmul.f32 %v4030_v46, %v4041_v14  ;;  %v794_v36 = vadd.f32 %v3388_v6, %v718_v62  ;;  %v977_v57 = vadd.f32 %v969_v29, %v902_v2  ;;  %v978_v35 = vadd.f32 %v4042_v1, %v903_v16  ;;  %v2347_v14 = vld [vmem:[#allocation2 + $0x121] ss:$2 sm:$0xff] }
 0x1db   : > { %v904_v56 = vadd.f32 %v896_v49, %v852_v47  ;;  %v1026_v44 = vadd.f32 %v1018_v61, %v974_v20  ;;  %v905_v41 = vadd.f32 %v897_v7, %v853_v33  ;;  %v1027_v51 = vadd.f32 %v1019_v8, %v975_v13  ;;  %v4045_v61 = vld [vmem:[#allocation83_spill] sm:$0xff]  ;;  %v4046_v49 = vld [vmem:[#allocation90_spill] sm:$0xff] }
 0x1dc   : > { %v1047_v9 = vpop.permute.xlu0 %1046  ;;  %v1028_v15 = vadd.f32 %v1020_v21, %v976_v43  ;;  %v1022_v58 = vmul.f32 %v4030_v46, %v4043_v11  ;;  %v1071_v42 = vmul.f32 %v3351_v39, %v4044_v32  ;;  %v3497_v62 = vrot.slane %v3155_v19, %v3148_v17  ;;  %v4047_v7 = vld [vmem:[#allocation102_spill] sm:$0xff]  ;;  %v4048_v21 = vld [vmem:[#allocation15_spill] sm:$0xff]  ;;  %v4050_v32 = vld [vmem:[#allocation88_spill] sm:$0xff] }
 0x1dd   : > { %v1072_v0 = vmul.f32 %v3351_v39, %v1047_v9  ;;  %1714 = vperm.xlu1 %2339, %v2346_v59   ;;  %v3493_v6 = vpop.permute.xlu1 %1342  ;;  %v1204_v2 = vmul.f32 %v4039_v26, %v4045_v61  ;;  %v1070_v16 = vmul.f32 %v3351_v39, %v4046_v49  ;;  %v1148_v13 = vmul.f32 %v3180_v45, %v4047_v7  ;;  %v4049_v59 = vld [vmem:[#allocation85_spill] sm:$0xff] }
 0x1de   : > { %v846_v33 = vadd.f32 %v3435_v55, %v794_v36  ;;  %v1029_v20 = vadd.f32 %v1021_v22, %v977_v57  ;;  %v979_v43 = vadd.f32 %v971_v23, %v904_v56  ;;  %v1030_v8 = vadd.f32 %v1022_v58, %v978_v35  ;;  %v4051_v22 = vld [vmem:[#allocation94_spill] sm:$0xff]  ;;  %v4052_v57 = vld [vmem:[#allocation96_spill] sm:$0xff] }
 0x1df   : > { %v1080_v29 = vadd.f32 %v1072_v0, %v1028_v15  ;;  %v980_v9 = vadd.f32 %v4048_v21, %v905_v41  ;;  %v1078_v1 = vadd.f32 %v1070_v16, %v1026_v44  ;;  %v3510_v11 = vmul.f32 %v3336_v10, %v4049_v59  ;;  %v4053_v35 = vld [vmem:[#allocation104_spill] sm:$0xff] }
 0x1e0   : > { %v1055_v47 = vpop.permute.xlu0 %1054  ;;  %v1024_v15 = vmul.f32 %v4030_v46, %v4050_v32  ;;  %v3514_v55 = vadd.f32 %v1071_v42, %v1027_v51  ;;  %v1073_v23 = vmul.f32 %v3351_v39, %v4051_v22  ;;  %v1075_v56 = vmul.f32 %v3351_v39, %v4052_v57 }
 0x1e1   : > { %v1156_v12 = vadd.f32 %v1148_v13, %v1080_v29  ;;  %v1074_v19 = vmul.f32 %v3351_v39, %v1055_v47  ;;  %1722 = vperm.xlu1 %2339, %v2347_v14   ;;  %v3518_v36 = vpop.permute.xlu1 %1350  ;;  %v1150_v44 = vmul.f32 %v3180_v45, %v4053_v35  ;;  %v1252_v58 = vmul.f32 %v3410_v50, %v3322_v53  ;;  %v2348_v13 = vld [vmem:[#allocation2 + $0x181] ss:$2 sm:$0xff]  ;;  %v4055_v14 = vld [vmem:[#allocation106_spill] sm:$0xff] }
 0x1e2   : > { %v1031_v61 = vadd.f32 %v1023_v30, %v979_v43  ;;  %v898_v46 = vadd.f32 %v3428_v34, %v846_v33  ;;  %v1081_v42 = vadd.f32 %v1073_v23, %v1029_v20  ;;  %v1032_v16 = vadd.f32 %v1024_v15, %v980_v9  ;;  %v4054_v29 = vld [vmem:[#allocation17_spill] sm:$0xff]  ;;  %v4057_v53 = vld [vmem:[#allocation114_spill] sm:$0xff]  ;;  %v4059_v15 = vld [vmem:[#allocation19_spill] sm:$0xff] }
 0x1e3   : > { %v1208_v0 = vadd.f32 %v1200_v63, %v1156_v12  ;;  %v1082_v41 = vadd.f32 %v1074_v19, %v1030_v8  ;;  %v1154_v47 = vadd.f32 %v4054_v29, %v1078_v1  ;;  %v1152_v63 = vmul.f32 %v3180_v45, %v4055_v14  ;;  %v4056_v8 = vld [vmem:[#allocation108_spill] sm:$0xff]  ;;  %v4058_v9 = vld [vmem:[#allocation9_spill] sm:$0xff]  ;;  %v4064_v14 = vld [vmem:[#allocation111_spill] sm:$0xff] }
 0x1e4   : > { %v1063_v51 = vpop.permute.xlu0 %1062  ;;  %v1198_v12 = vmul.f32 %v4039_v26, %v4056_v8  ;;  %v1201_v30 = vmul.f32 %v4039_v26, %v4057_v53  ;;  %v1254_v20 = vmul.f32 %v3410_v50, %v3354_v28  ;;  %v973_v1 = vadd.f32 %v4058_v9, %v898_v46  ;;  %v4063_v29 = vld [vmem:[#allocation20_spill] sm:$0xff] }
 0x1e5   : > { %v1158_v49 = vadd.f32 %v1150_v44, %v1082_v41  ;;  %v1076_v7 = vmul.f32 %v3351_v39, %v1063_v51  ;;  %1730 = vperm.xlu1 %2339, %v2348_v13   ;;  %v1355_v34 = vpop.permute.xlu1 %1354  ;;  %v1260_v33 = vadd.f32 %v1252_v58, %v1208_v0  ;;  %v1157_v22 = vadd.f32 %v4059_v15, %v1081_v42  ;;  %v4061_v51 = vld [vmem:[#allocation21_spill] sm:$0xff]  ;;  %v4065_v8 = vld [vmem:[#allocation116_spill] sm:$0xff] }
 0x1e6   : > { %v1380_v21 = vmul.f32 %v3336_v10, %v1355_v34  ;;  %v1083_v23 = vadd.f32 %v1075_v56, %v1031_v61  ;;  %v1206_v35 = vadd.f32 %v1198_v12, %v1154_v47  ;;  %v4060_v0 = vmov 2  }
 0x1e7   : > { %v1210_v43 = vadd.f32 %v1202_v31, %v1158_v49  ;;  %v1084_v19 = vadd.f32 %v1076_v7, %v1032_v16  ;;  %v1336_v59 = vadd.f32 %v3332_v38, %v1260_v33  ;;  %v1256_v28 = vmul.f32 %v3410_v50, %v3380_v48  ;;  %v4062_v16 = vld [vmem:[#allocation100_spill] sm:$0xff]  ;;  %v4066_v33 = vld [vmem:[#allocation22_spill] sm:$0xff] }
 0x1e8   : > { %v1219_v32 = vpop.permute.xlu0 %1218  ;;  %v1326_v31 = vmul.f32 %v3184_v18, %v3404_v24  ;;  %v1069_v38 = vmul.f32 %v3351_v39, %v3462_v54  ;;  %v1147_v48 = vmul.f32 %v3180_v45, %v4062_v16  ;;  %v1025_v7 = vadd.f32 %v3478_v40, %v973_v1  ;;  %v4068_v1 = vld [vmem:[#allocation98_spill] sm:$0xff] }
 0x1e9   : > { %v1160_v57 = vadd.f32 %v1152_v63, %v1084_v19  ;;  %v1250_v44 = vmul.f32 %v3410_v50, %v1219_v32  ;;  %2340 = vset.pattern.permute.xlu1 %v4060_v0  ;;  %v1262_v41 = vadd.f32 %v1254_v20, %v1210_v43  ;;  %v3549_v58 = vadd.f32 %v1380_v21, %v1336_v59  ;;  %v1363_v56 = vpop.permute.xlu1 %1362  ;;  %v4067_v21 = vld [vmem:[#allocation87_spill] sm:$0xff] }
 0x1ea   : > { %1758 = vperm.xlu1 %2340, %v3999_v60   ;;  %v1382_v49 = vmul.f32 %v3336_v10, %v1363_v56  ;;  %v1209_v24 = vadd.f32 %v1201_v30, %v1157_v22  ;;  %v1159_v39 = vadd.f32 %v4063_v29, %v1083_v23  ;;  %v1199_v63 = vmul.f32 %v4039_v26, %v4064_v14 }
 0x1eb   : > { %v1212_v61 = vadd.f32 %v1204_v2, %v1160_v57  ;;  %v1258_v46 = vadd.f32 %v1250_v44, %v1206_v35  ;;  %v1338_v42 = vadd.f32 %v4061_v51, %v1262_v41  ;;  %v1203_v12 = vmul.f32 %v4039_v26, %v4065_v8  ;;  %v3605_v8 = vld [vmem:[#allocation2 + $0x92] ss:$2 sm:$0xff] }
 0x1ec   : > { %v1231_v13 = vpop.permute.xlu0 %1230  ;;  %v1329_v53 = vmul.f32 %v3184_v18, %v3448_v25  ;;  %v1077_v40 = vadd.f32 %v1069_v38, %v1025_v7  ;;  %v1381_v9 = vmul.f32 %v3336_v10, %v4067_v21  ;;  %v1145_v59 = vmul.f32 %v3180_v45, %v4068_v1  ;;  %v4069_v25 = vld [vmem:[#allocation12_spill] sm:$0xff]  ;;  %v4077_v1 = vld [vmem:[#allocation110_spill] sm:$0xff] }
 0x1ed   : > { %v1334_v54 = vadd.f32 %v1326_v31, %v1258_v46  ;;  %v3558_v47 = vadd.f32 %v1382_v49, %v1338_v42  ;;  %v1253_v60 = vmul.f32 %v3410_v50, %v1231_v13  ;;  %v1264_v2 = vadd.f32 %v1256_v28, %v1212_v61  ;;  %v1371_v30 = vpop.permute.xlu1 %1370  ;;  %v4070_v46 = vld [vmem:[#allocation78_spill] sm:$0xff]  ;;  %v4071_v42 = vld [vmem:[#allocation89_spill] sm:$0xff] }
 0x1ee   : > { %1762 = vperm.xlu1 %2340, %v3365_v37   ;;  %v1384_v43 = vmul.f32 %v3336_v10, %v1371_v30  ;;  %v1155_v32 = vadd.f32 %v1147_v48, %v3514_v55  ;;  %v1251_v15 = vmul.f32 %v3410_v50, %v4069_v25  ;;  %v1211_v57 = vadd.f32 %v1203_v12, %v1159_v39  ;;  %v4072_v13 = vld [vmem:[#allocation14_spill] sm:$0xff]  ;;  %v4075_v12 = vld [vmem:[#allocation33_spill] sm:$0xff] }
 0x1ef   : > { %v1261_v34 = vadd.f32 %v1253_v60, %v1209_v24  ;;  %v1340_v20 = vadd.f32 %v4066_v33, %v1264_v2  ;;  %v1386_v19 = vadd.f32 %v3510_v11, %v1334_v54  ;;  %v1327_v11 = vmul.f32 %v3184_v18, %v3424_v4  ;;  %v4074_v60 = vld [vmem:[#allocation57_spill] sm:$0xff] }
 0x1f0   : > { %v1239_v37 = vpop.permute.xlu0 %1238  ;;  %v1207_v44 = vadd.f32 %v1199_v63, %v1155_v32  ;;  %v1153_v41 = vadd.f32 %v1145_v59, %v1077_v40  ;;  %v1331_v45 = vmul.f32 %v3184_v18, %v3467_v3  ;;  %v1379_v56 = vmul.f32 %v3336_v10, %v3518_v36  ;;  %v3628_v25 = vld [vmem:[#allocation2 + $0xc2] ss:$2 sm:$0xff] }
 0x1f1   : > { %v1337_v22 = vadd.f32 %v1329_v53, %v1261_v34  ;;  %v3578_v23 = vadd.f32 %v1384_v43, %v1340_v20  ;;  %v1255_v35 = vmul.f32 %v3410_v50, %v1239_v37  ;;  %v1197_v51 = vmul.f32 %v4039_v26, %v4070_v46  ;;  %v4078_v37 = vld [vmem:[#allocation91_spill] sm:$0xff] }
 0x1f2   : > { %1770 = vperm.xlu1 %2340, %v4010_v27   ;;  %v1399_v28 = vpop.permute.xlu1 %1398  ;;  %v1259_v38 = vadd.f32 %v1251_v15, %v1207_v44  ;;  %v1383_v4 = vmul.f32 %v3336_v10, %v4071_v42  ;;  %v1249_v29 = vmul.f32 %v3410_v50, %v4072_v13  ;;  %v4073_v26 = vmov 0   ;;  %v4079_v42 = vld [vmem:[#allocation93_spill] sm:$0xff] }
 0x1f3   : > { %v1263_v55 = vadd.f32 %v1255_v35, %v1211_v57  ;;  %v1389_v31 = vadd.f32 %v1381_v9, %v1337_v22  ;;  %v1430_v61 = vmul.f32 %v3497_v62, %v1399_v28  ;;  %v1205_v3 = vadd.f32 %v1197_v51, %v1153_v41  ;;  %v4076_v9 = vld [vmem:[#allocation113_spill] sm:$0xff] }
 0x1f4   : > { %v1335_v49 = vadd.f32 %v1327_v11, %v1259_v38  ;;  %v1395_v14 = vpop.permute.xlu0 %1394  ;;  %v1325_v53 = vmul.f32 %v3184_v18, %v4075_v12  ;;  %v1377_v20 = vmul.f32 %v3336_v10, %v3493_v6  ;;  %v3634_v35 = vld [vmem:[#allocation2 + $0x122] ss:$2 sm:$0xff] }
 0x1f5   : > { %v1339_v27 = vadd.f32 %v1331_v45, %v1263_v55  ;;  %v3593_v16 = vadd.f32 %v1430_v61, %v1386_v19  ;;  %v1257_v54 = vadd.f32 %v1249_v29, %v1205_v3  ;;  %v1429_v43 = vmul.f32 %v3497_v62, %v1395_v14  ;;  %v2353_v14 = vld [vmem:[#allocation2 + $0xf2] ss:$2 sm:$0xff] }
 0x1f6   : > { %1778 = vperm.xlu1 %2340, %v4015_v5   ;;  %v1403_v48 = vpop.permute.xlu1 %1402  ;;  %v1387_v24 = vadd.f32 %v1379_v56, %v1335_v49  ;;  %v355_v5 = vld [vmem:[%s3808_s1 + $0xc] sm:$0x3] }
 0x1f7   : > { %v1391_v7 = vadd.f32 %v1383_v4, %v1339_v27  ;;  %v1431_v36 = vmul.f32 %v3497_v62, %v1403_v48  ;;  %v3611_v40 = vunpack.c.l.bf16 %v355_v5  ;;  %v1333_v30 = vadd.f32 %v1325_v53, %v1257_v54  ;;  %v2352_v49 = vld [vmem:[#allocation2 + $0x62] ss:$2 sm:$0xff] }
 0x1f8   : > { %v1407_v19 = vpop.permute.xlu0 %1406 }
 0x1f9   : > { %v1439_v39 = vadd.f32 %v1431_v36, %v1387_v24  ;;  %v3622_v18 = vrot.slane %v3611_v40, %v4076_v9  ;;  %v3626_v59 = vrot.slane %v3611_v40, %v4077_v1  ;;  %v1385_v32 = vadd.f32 %v1377_v20, %v1333_v30  ;;  %v4080_v36 = vld [vmem:[#allocation95_spill] sm:$0xff] }
 0x1fa   : > { %2341 = vset.pattern.permute.xlu1 %v4073_v26  ;;  %v1411_v2 = vpop.permute.xlu1 %1410  ;;  %v1432_v41 = vmul.f32 %v3497_v62, %v1407_v19 }
 0x1fb   : > { %1823 = vperm.xlu1 %2341, %v4074_v60   ;;  %v1433_v63 = vmul.f32 %v3497_v62, %v1411_v2  ;;  %v1437_v10 = vadd.f32 %v1429_v43, %v1385_v32  ;;  %v1557_v22 = vmul.f32 %v3626_v59, %v4078_v37  ;;  %v1560_v4 = vmul.f32 %v3626_v59, %v4079_v42  ;;  %v4081_v60 = vld [vmem:[#allocation97_spill] sm:$0xff]  ;;  %v4083_v43 = vld [vmem:[#allocation43_spill] sm:$0xff]  ;;  %v4084_v37 = vld [vmem:[#allocation44_spill] sm:$0xff] }
 0x1fc   : > { %v1415_v44 = vpop.permute.xlu0 %1414  ;;  %v1440_v56 = vadd.f32 %v1432_v41, %v3549_v58  ;;  %v1562_v13 = vmul.f32 %v3626_v59, %v4080_v36  ;;  %v1509_v19 = vmul.f32 %v3622_v18, %v4083_v43  ;;  %v4085_v36 = vld [vmem:[#allocation99_spill] sm:$0xff] }
 0x1fd   : > { %v3609_v50 = vadd.f32 %v1433_v63, %v1389_v31  ;;  %v2351_v31 = vld [vmem:[#allocation2 + $0x182] ss:$2 sm:$0xff]  ;;  %v1434_v61 = vmul.f32 %v3497_v62, %v1415_v44 }
 0x1fe   : > { %v1419_v34 = vpop.permute.xlu1 %1418 }
 0x1ff   : > { %1833 = vperm.xlu1 %2341, %v3605_v8   ;;  %v1435_v33 = vmul.f32 %v3497_v62, %v1419_v34  ;;  %v1442_v48 = vadd.f32 %v1434_v61, %v3558_v47  ;;  %v1564_v47 = vmul.f32 %v3626_v59, %v4081_v60 }
 0x200   : > { %v1423_v51 = vpop.permute.xlu0 %1422 }
 0x201   : > { %v3618_v21 = vadd.f32 %v1435_v33, %v1391_v7  ;;  %v1436_v7 = vmul.f32 %v3497_v62, %v1423_v51  ;;  %v4082_v62 = vld [vmem:[#allocation41_spill] sm:$0xff] }
 0x202   : > { %v1506_v5 = vmul.f32 %v3622_v18, %v4082_v62 }
 0x203   : > { %1838 = vperm.xlu1 %2341, %v3628_v25   ;;  %v1464_v15 = vpop.permute.xlu1 %1463  ;;  %v1444_v26 = vadd.f32 %v1436_v7, %v3578_v23  ;;  %v2354_v23 = vld [vmem:[#allocation2 + $0x152] ss:$2 sm:$0xff] }
 0x204   : > { %v1505_v6 = vmul.f32 %v3622_v18, %v1464_v15  ;;  %v1514_v53 = vadd.f32 %v1506_v5, %v3593_v16  ;;  %v2355_v15 = vld [vmem:[#allocation2 + $0x32] ss:$2 sm:$0xff] }
 0x206   : > { %v1513_v57 = vadd.f32 %v1505_v6, %v1437_v10  ;;  %v1517_v6 = vadd.f32 %v1509_v19, %v3609_v50 }
 0x207   : > { %1848 = vperm.xlu1 %2341, %v3634_v35   ;;  %v1474_v11 = vpop.permute.xlu1 %1473 }
 0x208   : > { %v1507_v45 = vmul.f32 %v3622_v18, %v1474_v11  ;;  %v1565_v55 = vadd.f32 %v1557_v22, %v1513_v57  ;;  %v1511_v22 = vmul.f32 %v3622_v18, %v4084_v37 }
 0x20a   : > { %v1515_v28 = vadd.f32 %v1507_v45, %v1439_v39  ;;  %v1519_v11 = vadd.f32 %v1511_v22, %v3618_v21 }
 0x20b   : > { %1858 = vperm.xlu1 %2341, %v2351_v31   ;;  %v1479_v38 = vpop.permute.xlu1 %1478 }
 0x20c   : > { %v1508_v46 = vmul.f32 %v3622_v18, %v1479_v38 }
 0x20e   : > { %v1516_v27 = vadd.f32 %v1508_v46, %v1440_v56 }
 0x20f   : > { %2343 = vset.pattern.permute.xlu1 %v4022_v52  ;;  %v1489_v3 = vpop.permute.xlu1 %1488 }
 0x210   : > { %1886 = vperm.xlu1 %2343, %v2352_v49   ;;  %v1510_v58 = vmul.f32 %v3622_v18, %v1489_v3  ;;  %v1568_v24 = vadd.f32 %v1560_v4, %v1516_v27  ;;  %v1579_v27 = vpop.permute.xlu0 %1578 }
 0x212   : > { %v1518_v29 = vadd.f32 %v1510_v58, %v1442_v48 }
 0x213   : > { %v1499_v39 = vpop.permute.xlu1 %1498 }
 0x214   : > { %1890 = vperm.xlu1 %2343, %v3605_v8   ;;  %v1512_v52 = vmul.f32 %v3622_v18, %v1499_v39  ;;  %v1570_v54 = vadd.f32 %v1562_v13, %v1518_v29 }
 0x216   : > { %v1520_v2 = vadd.f32 %v1512_v52, %v1444_v26 }
 0x218   : > { %1898 = vperm.xlu1 %2343, %v2353_v14   ;;  %v1527_v63 = vpop.permute.xlu1 %1526  ;;  %v1572_v12 = vadd.f32 %v1564_v47, %v1520_v2 }
 0x219   : > { %v1558_v30 = vmul.f32 %v3626_v59, %v1527_v63  ;;  %v4086_v63 = vld [vmem:[#allocation101_spill] sm:$0xff] }
 0x21b   : > { %v1566_v34 = vadd.f32 %v1558_v30, %v1514_v53 }
 0x21c   : > { %1906 = vperm.xlu1 %2343, %v2354_v23   ;;  %v1531_v33 = vpop.permute.xlu1 %1530 }
 0x21d   : > { %v1559_v20 = vmul.f32 %v3626_v59, %v1531_v33 }
 0x21f   : > { %v1567_v32 = vadd.f32 %v1559_v20, %v1515_v28  ;;  %v4087_v20 = vld [vmem:[#allocation103_spill] sm:$0xff] }
 0x220   : > { %2345 = vset.pattern.permute.xlu1 %v4060_v0  ;;  %v1539_v10 = vpop.permute.xlu1 %1538  ;;  %v1608_v0 = vrot.slane %v3611_v40, %v3148_v17 }
 0x221   : > { %1934 = vperm.xlu1 %2345, %v2355_v15   ;;  %v1561_v16 = vmul.f32 %v3626_v59, %v1539_v10 }
 0x222   : > { %v1610_v49 = vmul.f32 %v1608_v0, %v1579_v27 }
 0x223   : > { %v1569_v57 = vadd.f32 %v1561_v16, %v1517_v6 }
 0x224   : > { %v1547_v44 = vpop.permute.xlu1 %1546  ;;  %v1618_v7 = vadd.f32 %v1610_v49, %v1566_v34 }
 0x225   : > { %1942 = vperm.xlu1 %2345, %v3605_v8   ;;  %v1563_v41 = vmul.f32 %v3626_v59, %v1547_v44  ;;  %v356_v59 = vld [vmem:[%s3808_s1 + $0xe] sm:$0x3] }
 0x227   : > { %v1571_v45 = vadd.f32 %v1563_v41, %v1519_v11  ;;  %v4089_v11 = vld [vmem:[#allocation49_spill] sm:$0xff] }
 0x229   : > { %1946 = vperm.xlu1 %2345, %v3628_v25   ;;  %v1575_v50 = vpop.permute.xlu1 %1574  ;;  %v365_v25 = vunpack.c.l.bf16 %v356_v59  ;;  %v4091_v59 = vld [vmem:[#allocation55_spill] sm:$0xff] }
 0x22a   : > { %v1609_v28 = vmul.f32 %v1608_v0, %v1575_v50 }
 0x22b   : > { %v1684_v3 = vrot.slane %v365_v25, %v4076_v9 }
 0x22c   : > { %v1617_v38 = vadd.f32 %v1609_v28, %v1565_v55 }
 0x22d   : > { %1954 = vperm.xlu1 %2345, %v3634_v35   ;;  %v1583_v18 = vpop.permute.xlu1 %1582  ;;  %v1688_v41 = vmul.f32 %v1684_v3, %v4089_v11 }
 0x22e   : > { %v1611_v56 = vmul.f32 %v1608_v0, %v1583_v18  ;;  %v4090_v18 = vld [vmem:[#allocation52_spill] sm:$0xff] }
 0x230   : > { %v1619_v61 = vadd.f32 %v1611_v56, %v1567_v32  ;;  %v4088_v32 = vld [vmem:[#allocation46_spill] sm:$0xff]  ;;  %v1690_v56 = vmul.f32 %v1684_v3, %v4090_v18 }
 0x231   : > { %1962 = vperm.xlu1 %2345, %v2351_v31   ;;  %v1587_v8 = vpop.permute.xlu1 %1586  ;;  %v1736_v31 = vrot.slane %v365_v25, %v4077_v1  ;;  %v1685_v15 = vmul.f32 %v1684_v3, %v4088_v32 }
 0x232   : > { %v1612_v46 = vmul.f32 %v1608_v0, %v1587_v8 }
 0x233   : > { %v1738_v13 = vmul.f32 %v1736_v31, %v4085_v36  ;;  %v1743_v43 = vmul.f32 %v1736_v31, %v4087_v20  ;;  %v1693_v16 = vadd.f32 %v1685_v15, %v1617_v38  ;;  %v1788_v36 = vrot.slane %v365_v25, %v3148_v17  ;;  %v4094_v15 = vld [vmem:[#allocation109_spill] sm:$0xff] }
 0x234   : > { %v1620_v21 = vadd.f32 %v1612_v46, %v1568_v24  ;;  %v1591_v24 = vpop.permute.xlu0 %1590 }
 0x235   : > { %v1595_v51 = vpop.permute.xlu1 %1594  ;;  %v1613_v26 = vmul.f32 %v1608_v0, %v1591_v24 }
 0x236   : > { %v1614_v40 = vmul.f32 %v1608_v0, %v1595_v51  ;;  %v1696_v50 = vadd.f32 %v1688_v41, %v1620_v21  ;;  %v357_v21 = vld [vmem:[%s3808_s1 + $0x10] sm:$0x3]  ;;  %v4095_v41 = vld [vmem:[#allocation112_spill] sm:$0xff] }
 0x237   : > { %v1621_v5 = vadd.f32 %v1613_v26, %v1569_v57  ;;  %v366_v24 = vunpack.c.l.bf16 %v357_v21 }
 0x238   : > { %v1622_v42 = vadd.f32 %v1614_v40, %v1570_v54  ;;  %v1599_v47 = vpop.permute.xlu0 %1598  ;;  %v1692_v40 = vmul.f32 %v1684_v3, %v4091_v59 }
 0x239   : > { %v1603_v4 = vpop.permute.xlu1 %1602  ;;  %v1615_v62 = vmul.f32 %v1608_v0, %v1599_v47 }
 0x23a   : > { %v1616_v55 = vmul.f32 %v1608_v0, %v1603_v4  ;;  %v1698_v46 = vadd.f32 %v1690_v56, %v1622_v42 }
 0x23b   : > { %v1623_v34 = vadd.f32 %v1615_v62, %v1571_v45 }
 0x23c   : > { %v1624_v35 = vadd.f32 %v1616_v55, %v1572_v12  ;;  %v1741_v12 = vmul.f32 %v1736_v31, %v4086_v63  ;;  %v1755_v42 = vpop.permute.xlu0 %1754 }
 0x23e   : > { %v1649_v48 = vpop.permute.xlu1 %1648  ;;  %v1700_v27 = vadd.f32 %v1692_v40, %v1624_v35  ;;  %v1789_v35 = vmul.f32 %v1788_v36, %v1755_v42 }
 0x23f   : > { %v1686_v58 = vmul.f32 %v1684_v3, %v1649_v48 }
 0x241   : > { %v1694_v29 = vadd.f32 %v1686_v58, %v1618_v7 }
 0x242   : > { %v1654_v39 = vpop.permute.xlu1 %1653 }
 0x243   : > { %v1687_v52 = vmul.f32 %v1684_v3, %v1654_v39  ;;  %v3680_v54 = vadd.f32 %v1738_v13, %v1694_v29  ;;  %v3699_v29 = vrot.slane %v366_v24, %v4076_v9 }
 0x245   : > { %v1695_v60 = vadd.f32 %v1687_v52, %v1619_v61  ;;  %v1767_v52 = vpop.permute.xlu0 %1766 }
 0x246   : > { %v1664_v2 = vpop.permute.xlu1 %1663 }
 0x247   : > { %v1689_v14 = vmul.f32 %v1684_v3, %v1664_v2 }
 0x249   : > { %v1697_v53 = vadd.f32 %v1689_v14, %v1621_v5  ;;  %v1792_v5 = vmul.f32 %v1788_v36, %v1767_v52  ;;  %v1775_v14 = vpop.permute.xlu0 %1774 }
 0x24a   : > { %v1674_v30 = vpop.permute.xlu1 %1673 }
 0x24b   : > { %v1691_v23 = vmul.f32 %v1684_v3, %v1674_v30  ;;  %v3683_v33 = vadd.f32 %v1741_v12, %v1697_v53  ;;  %v3702_v3 = vrot.slane %v366_v24, %v4077_v1  ;;  %v4093_v1 = vld [vmem:[#allocation107_spill] sm:$0xff]  ;;  %v1794_v30 = vmul.f32 %v1788_v36, %v1775_v14  ;;  %v2161_v14 = vld [vmem:[%s3810_s3] ss:$0 sm:$0xff] }
 0x24d   : > { %v1699_v19 = vadd.f32 %v1691_v23, %v1623_v34  ;;  %v1920_v53 = vmul.f32 %v3702_v3, %v4093_v1  ;;  %v1783_v32 = vpop.permute.xlu0 %1782  ;;  %v4098_v1 = vld [vmem:[#allocation61_spill] sm:$0xff] }
 0x24f   : > { %v3687_v6 = vadd.f32 %v1743_v43, %v1699_v19 }
 0x250   : > { %v1703_v10 = vpop.permute.xlu1 %1702 }
 0x251   : > { %v1737_v37 = vmul.f32 %v1736_v31, %v1703_v10  ;;  %v1922_v10 = vmul.f32 %v3702_v3, %v4094_v15 }
 0x253   : > { %v1745_v22 = vadd.f32 %v1737_v37, %v1693_v16  ;;  %v1796_v16 = vmul.f32 %v1788_v36, %v1783_v32 }
 0x254   : > { %v1711_v57 = vpop.permute.xlu1 %1710 }
 0x255   : > { %v1739_v44 = vmul.f32 %v1736_v31, %v1711_v57  ;;  %v1797_v39 = vadd.f32 %v1789_v35, %v1745_v22 }
 0x257   : > { %v3690_v0 = vadd.f32 %v1739_v44, %v1695_v60  ;;  %v4092_v60 = vld [vmem:[#allocation105_spill] sm:$0xff] }
 0x258   : > { %v1715_v45 = vpop.permute.xlu1 %1714  ;;  %v1917_v47 = vmul.f32 %v3702_v3, %v4092_v60 }
 0x259   : > { %v1740_v28 = vmul.f32 %v1736_v31, %v1715_v45  ;;  %v1924_v45 = vmul.f32 %v3702_v3, %v4095_v41 }
 0x25b   : > { %v1748_v61 = vadd.f32 %v1740_v28, %v1696_v50 }
 0x25c   : > { %v1723_v8 = vpop.permute.xlu1 %1722 }
 0x25d   : > { %v1742_v51 = vmul.f32 %v1736_v31, %v1723_v8  ;;  %v1800_v9 = vadd.f32 %v1792_v5, %v1748_v61 }
 0x25f   : > { %v1750_v38 = vadd.f32 %v1742_v51, %v1698_v46  ;;  %v4096_v46 = vld [vmem:[#allocation58_spill] sm:$0xff] }
 0x260   : > { %v1731_v4 = vpop.permute.xlu1 %1730  ;;  %v1866_v51 = vmul.f32 %v3699_v29, %v4096_v46 }
 0x261   : > { %v1744_v55 = vmul.f32 %v1736_v31, %v1731_v4  ;;  %v1802_v20 = vadd.f32 %v1794_v30, %v1750_v38  ;;  %v1968_v38 = vrot.slane %v366_v24, %v3148_v17 }
 0x263   : > { %v1752_v49 = vadd.f32 %v1744_v55, %v1700_v27 }
 0x265   : > { %v1759_v48 = vpop.permute.xlu1 %1758  ;;  %v1804_v57 = vadd.f32 %v1796_v16, %v1752_v49  ;;  %v1939_v49 = vpop.permute.xlu0 %1938 }
 0x266   : > { %v1790_v56 = vmul.f32 %v1788_v36, %v1759_v48  ;;  %v1970_v42 = vmul.f32 %v1968_v38, %v1939_v49 }
 0x268   : > { %v1798_v8 = vadd.f32 %v1790_v56, %v3680_v54 }
 0x269   : > { %v1763_v7 = vpop.permute.xlu1 %1762  ;;  %v1951_v5 = vpop.permute.xlu0 %1950 }
 0x26a   : > { %v1874_v4 = vadd.f32 %v1866_v51, %v1798_v8  ;;  %v1791_v35 = vmul.f32 %v1788_v36, %v1763_v7 }
 0x26c   : > { %v1799_v17 = vadd.f32 %v1791_v35, %v3690_v0 }
 0x26d   : > { %v1771_v58 = vpop.permute.xlu1 %1770 }
 0x26e   : > { %v1793_v21 = vmul.f32 %v1788_v36, %v1771_v58  ;;  %v4097_v58 = vld [vmem:[#allocation60_spill] sm:$0xff] }
 0x26f   : > { %v1869_v7 = vmul.f32 %v3699_v29, %v4097_v58 }
 0x270   : > { %v1801_v54 = vadd.f32 %v1793_v21, %v3683_v33 }
 0x271   : > { %v1779_v13 = vpop.permute.xlu1 %1778 }
 0x272   : > { %v1795_v24 = vmul.f32 %v1788_v36, %v1779_v13  ;;  %v1877_v0 = vadd.f32 %v1869_v7, %v1801_v54 }
 0x274   : > { %v1803_v36 = vadd.f32 %v1795_v24, %v3687_v6  ;;  %v1959_v6 = vpop.permute.xlu0 %1958 }
 0x276   : > { %v1824_v31 = vpop.permute.xlu1 %1823 }
 0x277   : > { %v1865_v26 = vmul.f32 %v3699_v29, %v1824_v31 }
 0x279   : > { %v1873_v2 = vadd.f32 %v1865_v26, %v1797_v39  ;;  %v2160_v39 = vld [vmem:[%s3809_s2] ss:$0 sm:$0xff] }
 0x27a   : > { %v1834_v62 = vpop.permute.xlu1 %1833 }
 0x27b   : > { %v1925_v25 = vadd.f32 %v1917_v47, %v1873_v2  ;;  %v1867_v48 = vmul.f32 %v3699_v29, %v1834_v62 }
 0x27d   : > { %v1875_v2 = vadd.f32 %v1867_v48, %v1799_v17 }
 0x27e   : > { %v1839_v63 = vpop.permute.xlu1 %1838 }
 0x27f   : > { %v1868_v12 = vmul.f32 %v3699_v29, %v1839_v63 }
 0x281   : > { %v1876_v34 = vadd.f32 %v1868_v12, %v1800_v9 }
 0x282   : > { %v1849_v23 = vpop.permute.xlu1 %1848 }
 0x283   : > { %v1870_v43 = vmul.f32 %v3699_v29, %v1849_v23  ;;  %v3711_v19 = vadd.f32 %v1920_v53, %v1876_v34  ;;  %v1871_v53 = vmul.f32 %v3699_v29, %v4098_v1 }
 0x285   : > { %v1878_v37 = vadd.f32 %v1870_v43, %v1802_v20  ;;  %v1973_v43 = vmul.f32 %v1968_v38, %v1951_v5  ;;  %v1879_v15 = vadd.f32 %v1871_v53, %v1803_v36 }
 0x286   : > { %v1859_v22 = vpop.permute.xlu1 %1858 }
 0x287   : > { %v1872_v44 = vmul.f32 %v3699_v29, %v1859_v22  ;;  %v3716_v11 = vadd.f32 %v1922_v10, %v1878_v37 }
 0x289   : > { %v1880_v50 = vadd.f32 %v1872_v44, %v1804_v57 }
 0x28b   : > { %v1887_v28 = vpop.permute.xlu1 %1886  ;;  %v3720_v18 = vadd.f32 %v1924_v45, %v1880_v50 }
 0x28c   : > { %v1918_v59 = vmul.f32 %v3702_v3, %v1887_v28 }
 0x28e   : > { %v1926_v27 = vadd.f32 %v1918_v59, %v1874_v4 }
 0x28f   : > { %v1891_v61 = vpop.permute.xlu1 %1890 }
 0x290   : > { %v1978_v31 = vadd.f32 %v1970_v42, %v1926_v27  ;;  %v1919_v52 = vmul.f32 %v3702_v3, %v1891_v61 }
 0x292   : > { %v1993_v33 = vmul.f32 %v2160_v39, %v1978_v31  ;;  %v1927_v13 = vadd.f32 %v1919_v52, %v1875_v2 }
 0x293   : > { %v1899_v40 = vpop.permute.xlu1 %1898 }
 0x294   : > { %v1921_v47 = vmul.f32 %v3702_v3, %v1899_v40  ;;  %v2008_v34 = vadd.f32 %v2161_v14, %v1993_v33 }
 0x296   : > { %v1929_v30 = vadd.f32 %v1921_v47, %v1877_v0 }
 0x297   : > { %v1907_v55 = vpop.permute.xlu1 %1906 }
 0x298   : > { %v1981_v37 = vadd.f32 %v1973_v43, %v1929_v30 }
 0x29a   : > { %v1996_v50 = vmul.f32 %v2160_v39, %v1981_v37 }
 0x29c   : > { %v1935_v26 = vpop.permute.xlu1 %1934 }
 0x29d   : > { %v1969_v60 = vmul.f32 %v1968_v38, %v1935_v26 }
 0x29f   : > { %v1977_v62 = vadd.f32 %v1969_v60, %v1925_v25  ;;  %v1923_v25 = vmul.f32 %v3702_v3, %v1907_v55  ;;  %v1975_v3 = vmul.f32 %v1968_v38, %v1959_v6 }
 0x2a0   : > { %v1943_v63 = vpop.permute.xlu1 %1942 }
 0x2a1   : > { %v1992_v9 = vmul.f32 %v2160_v39, %v1977_v62  ;;  %v1971_v12 = vmul.f32 %v1968_v38, %v1943_v63  ;;  %v1931_v22 = vadd.f32 %v1923_v25, %v1879_v15 }
 0x2a3   : > { %v2007_v23 = vadd.f32 %v2161_v14, %v1992_v9  ;;  %v1979_v20 = vadd.f32 %v1971_v12, %v1927_v13  ;;  %v1983_v28 = vadd.f32 %v1975_v3, %v1931_v22 }
 0x2a4   : > { %v1947_v32 = vpop.permute.xlu1 %1946 }
 0x2a5   : > { %v2236_v10 = vpack.c.bf16 %v2008_v34, %v2007_v23  ;;  %v1972_v16 = vmul.f32 %v1968_v38, %v1947_v32  ;;  %v1994_v57 = vmul.f32 %v2160_v39, %v1979_v20  ;;  %v1998_v4 = vmul.f32 %v2160_v39, %v1983_v28 }
 0x2a7   : > { %2237 = vst [vmem:[%s3747_s13] sm:$0xff] %v2236_v10   ;;  %v1980_v29 = vadd.f32 %v1972_v16, %v3711_v19  ;;  %v2009_v56 = vadd.f32 %v2161_v14, %v1994_v57  ;;  %v2011_v19 = vadd.f32 %v2161_v14, %v1996_v50  ;;  %v2013_v42 = vadd.f32 %v2161_v14, %v1998_v4 }
 0x2a8   : > { %v1955_v44 = vpop.permute.xlu1 %1954 }
 0x2a9   : > { %v1995_v41 = vmul.f32 %v2160_v39, %v1980_v29  ;;  %v1974_v45 = vmul.f32 %v1968_v38, %v1955_v44 }
 0x2ab   : > { %v2010_v61 = vadd.f32 %v2161_v14, %v1995_v41  ;;  %v1982_v8 = vadd.f32 %v1974_v45, %v3716_v11 }
 0x2ac   : > { %v1963_v46 = vpop.permute.xlu1 %1962 }
 0x2ad   : > { %v2241_v51 = vpack.c.bf16 %v2010_v61, %v2009_v56  ;;  %v1997_v59 = vmul.f32 %v2160_v39, %v1982_v8  ;;  %v1976_v40 = vmul.f32 %v1968_v38, %v1963_v46 }
 0x2af   : > { %2268 = vst [vmem:[%s3747_s13 + $0x8] sm:$0xff] %v2241_v51   ;;  %v2012_v27 = vadd.f32 %v2161_v14, %v1997_v59  ;;  %v1984_v55 = vadd.f32 %v1976_v40, %v3720_v18 }
 0x2b1   : > { %v2246_v49 = vpack.c.bf16 %v2012_v27, %v2011_v19  ;;  %v1999_v21 = vmul.f32 %v2160_v39, %v1984_v55 }
 0x2b3   : > { %2269 = vst [vmem:[%s3747_s13 + $0x10] sm:$0xff] %v2246_v49   ;;  %v2014_v11 = vadd.f32 %v2161_v14, %v1999_v21 }
 0x2b5   : > { %v2251_v38 = vpack.c.bf16 %v2014_v11, %v2013_v42 }
 0x2b7   : > { %2270 = vst [vmem:[%s3747_s13 + $0x18] sm:$0xff] %v2251_v38  }
 0x2b8   : > { %2369 = shalt.err (!%p2366_p3)
}
 0x2b9   : > { %s2370_s6 = scalar_lea.hbm %s3760_s27, 512  ;;  %s2374_s9 = scalar_lea.hbm %s3811_s4, 1024 }
 0x2ba   : > { %p2371_p4 = scmp.ne.s32.totalorder %s3760_s27, %s2370_s6  ;;  %p2375_p9 = scmp.lt.s32.totalorder %s3760_s27, %s3811_s4 }
 0x2bb   : > { %p2376_p10 = scmp.lt.s32.totalorder %s2374_s9, %s2370_s6 }
 0x2bc   : > { %p2372_p7 = pnand %p2371_p4, %p2488_p5 }
 0x2bd   : > { %p2377_p11 = por %p2376_p10, %p2375_p9 }
 0x2be   : > { %p2373_p8 = pneg %p2372_p7 }
 0x2c0   : > { %p2378_p12 = pnand %p2377_p11, %p2373_p8 }
 0x2c2   : > { %2381 = shalt.err (!%p2378_p12)
}
 0x2c3   : > { %s2423_s12 = smov 64   ;;  %s2424_s13 = smov 4  }
 0x2c4   : > { %2271 = dma.vmem_to_hbm [thread:$0]  (%p2488_p5), %s3762_s20, 512, %s3760_s27, %s3767_s28, %s2423_s12, %s2423_s12, %s2424_s13  }
 0x2c5 PF: > { %p2277_p13 = scmp.ge.s32.totalorder %s2416_s18, 2  ;;  %s2060_s14 = sand.u32 1, %s2404_s15  }
 0x2c6   : > { %s2061_s22 = scalar_lea.sflag [#allocation4], %s2060_s14 }
 0x2c7   : > { %p2274_p0 = pnand %p2277_p13, %p2492_p6 }
 0x2c9   : > { %p2275_p1 = pneg %p2274_p0 }
 0x2cb   : > { %2399 = dma.done.wait (%p2275_p1), %s2061_s22, 512  }
 0x2cc   : > { %2401 = vsyncadd (%p2275_p1), %s2061_s22, 4294966784  ;;  %p14_p2 = scmp.ge.s32.totalorder %s2475_s21, 4   ;;  %s4099_s15 = smov %s2408_s16 }
 0x2cd   : > { %s4100_s16 = smov %s2412_s17  ;;  %s4101_s17 = smov %s2486_s24 }
 0x2ce   : > { %s4102_s18 = smov %s2475_s21  ;;  %16 = sbr.rel (!%p14_p2) target bundleno = 3 (0x3), region = 142 }
 0x2d3   :  { %2066 = vsyncpa [#allocation4], 1 }
 0x2d4   :  { %2068 = vsyncpa [#allocation4 + $0x1], 1 }

</bundles_post_ra>
